<compile_context>
chip_gen: v7x
topology: tpu7x:2x2x1
jax: 0.10.0
libtpu: 0.0.40
codegen_flags: <defaults>
</compile_context>

<pallas_src>
import functools

import jax
import jax.numpy as jnp
from jax.experimental import pallas as pl
from jax.experimental.pallas import tpu as pltpu

_VMEM_TILE_BUDGET = 2 * 1024 * 1024  # target bytes for one padded input tile


def dwconv_kernel(x_ref, w_ref, b_ref, o_ref):
    # x_ref: (TH+2, W+2, Cb) padded/halo input tile
    # w_ref: (3, 3, Cb) depthwise weights for this channel block
    # b_ref: (1, Cb)    bias for this channel block
    # o_ref: (TH, W, Cb) output tile
    TH, W, Cb = o_ref.shape
    w = w_ref[...].astype(jnp.float32)          # (3, 3, Cb)
    acc = jnp.zeros((TH, W, Cb), jnp.float32)
    # 3 row-slab loads (one per kh); kw shifts are in-register value slices.
    for kh in range(3):
        rows = x_ref[kh:kh + TH, :, :].astype(jnp.float32)   # (TH, W+2, Cb)
        for kw in range(3):
            acc = acc + rows[:, kw:kw + W, :] * w[kh, kw, :]
    acc = acc + b_ref[0, :].astype(jnp.float32)
    o_ref[...] = acc.astype(o_ref.dtype)


def _pick_tile_h(H, W, Cb, itemsize, budget_bytes=_VMEM_TILE_BUDGET):
    """Largest divisor of H whose padded input tile fits the VMEM budget."""
    bytes_per_row = (W + 2) * Cb * itemsize
    max_th = max(1, budget_bytes // bytes_per_row - 2)
    best = 1
    for d in range(1, H + 1):
        if H % d == 0 and d <= max_th:
            best = d
    return best


def _dwconv_nhwc(x, w_33c, bias, tile_h, block_c):
    """Core implementation. x: (N,H,W,C) ; w_33c: (3,3,C) ; bias: (C,)."""
    N, H, W, C = x.shape
    dtype = x.dtype
    itemsize = jnp.dtype(dtype).itemsize

    if block_c is None:
        block_c = 128 if (C % 128 == 0) else C
    assert C % block_c == 0, "block_c must divide C"
    n_c = C // block_c

    if tile_h is None:
        tile_h = _pick_tile_h(H, W, block_c, itemsize)
    assert H % tile_h == 0, "tile_h must divide H"
    n_h = H // tile_h

    # Zero-pad spatially by 1 and build the overlapping-halo tiled layout
    # (N, n_h, tile_h+2, W+2, C).  Static slices + concat: fuses with the pad
    # (and the NCHW->NHWC transpose in the caller) into one XLA copy pass.
    xp = jnp.pad(x, ((0, 0), (1, 1), (1, 1), (0, 0)))
    if n_h == 1:
        xt = xp[:, None]
    else:
        xt = jnp.concatenate(
            [xp[:, None, h * tile_h:h * tile_h + tile_h + 2] for h in range(n_h)],
            axis=1)

    b = bias.reshape(1, C)

    out = pl.pallas_call(
        dwconv_kernel,
        out_shape=jax.ShapeDtypeStruct((N, H, W, C), dtype),
        grid_spec=pltpu.PrefetchScalarGridSpec(
            num_scalar_prefetch=0,
            grid=(N, n_c, n_h),   # h fastest: weights/bias stay VMEM-resident
            in_specs=[
                pl.BlockSpec((None, None, tile_h + 2, W + 2, block_c),
                             lambda n, c, h: (n, h, 0, 0, c)),
                pl.BlockSpec((3, 3, block_c), lambda n, c, h: (0, 0, c)),
                pl.BlockSpec((1, block_c), lambda n, c, h: (0, c)),
            ],
            out_specs=pl.BlockSpec((None, tile_h, W, block_c),
                                   lambda n, c, h: (n, h, 0, c)),
        ),
        compiler_params=pltpu.CompilerParams(
            dimension_semantics=("parallel", "parallel", "parallel")),
    )(xt, w_33c, b)
    return out


@functools.partial(jax.jit, static_argnames=("tile_h", "block_c"))
def dwconv_pallas_nhwc(x_nhwc, w_33c, bias, *, tile_h=None, block_c=None):
    """NHWC entry point (no layout transposes) for NHWC end-to-end models."""
    return _dwconv_nhwc(x_nhwc, w_33c, bias, tile_h, block_c)


@functools.partial(jax.jit, static_argnames=("tile_h", "block_c"))
def dwconv_pallas(x_nchw, weight, bias, *, tile_h=None, block_c=None):
    """Depthwise conv2d, kernel 3, stride 1, padding 1, groups=C (PyTorch layout).

    x_nchw : (N, C, H, W)
    weight : (C, 1, 3, 3)
    bias   : (C,)
    returns (N, C, H, W)
    """
    # NCHW <-> NHWC transposes are imposed by the PyTorch interface; inside one
    # jit the in-transpose fuses with the pad/halo pass above.
    x = jnp.transpose(x_nchw, (0, 2, 3, 1))
    w = jnp.transpose(weight[:, 0, :, :], (1, 2, 0))     # (3, 3, C)
    out_nhwc = _dwconv_nhwc(x, w, bias, tile_h, block_c)
    return jnp.transpose(out_nhwc, (0, 3, 1, 2))


def dwconv_reference(x_nchw, weight, bias):
    """Pure-JAX reference using lax.conv_general_dilated (grouped conv)."""
    C = x_nchw.shape[1]
    out = jax.lax.conv_general_dilated(
        x_nchw, weight,
        window_strides=(1, 1),
        padding=((1, 1), (1, 1)),
        feature_group_count=C,
        dimension_numbers=("NCHW", "OIHW", "NCHW"),
    )
    return out + bias.reshape(1, C, 1, 1)


if __name__ == "__main__":
    key = jax.random.PRNGKey(0)
    k_x, k_w, k_b = jax.random.split(key, 3)

    # Small test (harness shapes).
    N, C, H, W = 2, 4, 16, 16
    x = jax.random.normal(k_x, (N, C, H, W), dtype=jnp.float32)
    weight = jax.random.normal(k_w, (C, 1, 3, 3), dtype=jnp.float32) * 0.1
    bias = jax.random.normal(k_b, (C,), dtype=jnp.float32) * 0.1

    out = dwconv_pallas(x, weight, bias)
    out = jax.block_until_ready(out)
    ref = dwconv_reference(x, weight, bias)
    assert out.shape == (N, C, H, W)
    assert jnp.allclose(out, ref, atol=1e-5, rtol=1e-5)

    # Second test exercising the tiled path: 2 channel blocks of 128 lanes and
    # 3 H-tiles with halo (lane-aligned stores, multi-step pipeline).
    N2, C2, H2, W2 = 1, 256, 48, 20
    x2 = jax.random.normal(k_x, (N2, C2, H2, W2), dtype=jnp.float32)
    w2 = jax.random.normal(k_w, (C2, 1, 3, 3), dtype=jnp.float32) * 0.1
    b2 = jax.random.normal(k_b, (C2,), dtype=jnp.float32) * 0.1
    out2 = dwconv_pallas(x2, w2, b2, tile_h=16, block_c=128)
    out2 = jax.block_until_ready(out2)
    ref2 = dwconv_reference(x2, w2, b2)
    assert jnp.allclose(out2, ref2, atol=1e-4, rtol=1e-4)

    print("KERNEL_OK")
</pallas_src>

<mosaic_0001>
module attributes {stable_mosaic.version = 11 : i64} {
  func.func @dwconv_kernel(%arg0: i32, %arg1: i32, %arg2: i32, %arg3: memref<1x1x18x18x4xf32, #tpu.memory_space<vmem>>, %arg4: memref<3x3x4xf32, #tpu.memory_space<vmem>>, %arg5: memref<1x4xf32, #tpu.memory_space<vmem>>, %arg6: memref<1x16x16x4xf32, #tpu.memory_space<vmem>>) attributes {dimension_semantics = [#tpu.dimension_semantics<parallel>, #tpu.dimension_semantics<parallel>, #tpu.dimension_semantics<parallel>], iteration_bounds = array<i64: 2, 1, 1>, scalar_prefetch = 0 : i64, scratch_operands = 0 : i64, tpu.core_type = #tpu.core_type<tc>, window_params = [{transform_indices = @transform_0, window_bounds = array<i64: 1, 1, 18, 18, 4>}, {transform_indices = @transform_1, window_bounds = array<i64: 3, 3, 4>}, {transform_indices = @transform_2, window_bounds = array<i64: 1, 4>}, {transform_indices = @transform_3, window_bounds = array<i64: 1, 16, 16, 4>}]} {
    %c0 = arith.constant 0 : index
    %c0_0 = arith.constant 0 : index
    %c0_1 = arith.constant 0 : index
    %0 = vector.load %arg4[%c0, %c0_0, %c0_1] : memref<3x3x4xf32, #tpu.memory_space<vmem>>, vector<3x3x4xf32>
    %cst = arith.constant 0.000000e+00 : f32
    %1 = vector.broadcast %cst : f32 to vector<16x16x4xf32>
    %c0_2 = arith.constant 0 : index
    %c0_3 = arith.constant 0 : index
    %c0_4 = arith.constant 0 : index
    %c0_5 = arith.constant 0 : index
    %c0_6 = arith.constant 0 : index
    %2 = vector.load %arg3[%c0_2, %c0_3, %c0_4, %c0_5, %c0_6] : memref<1x1x18x18x4xf32, #tpu.memory_space<vmem>>, vector<1x1x16x18x4xf32>
    %3 = vector.shape_cast %2 : vector<1x1x16x18x4xf32> to vector<16x18x4xf32>
    %4 = vector.extract_strided_slice %3 {offsets = [0, 0, 0], sizes = [16, 16, 4], strides = [1, 1, 1]} : vector<16x18x4xf32> to vector<16x16x4xf32>
    %5 = vector.extract_strided_slice %0 {offsets = [0, 0, 0], sizes = [1, 1, 4], strides = [1, 1, 1]} : vector<3x3x4xf32> to vector<1x1x4xf32>
    %6 = vector.shape_cast %5 : vector<1x1x4xf32> to vector<4xf32>
    %7 = vector.shape_cast %6 : vector<4xf32> to vector<1x1x4xf32>
    %8 = vector.broadcast %7 : vector<1x1x4xf32> to vector<16x16x4xf32>
    %9 = arith.mulf %4, %8 : vector<16x16x4xf32>
    %10 = arith.addf %1, %9 : vector<16x16x4xf32>
    %11 = vector.extract_strided_slice %3 {offsets = [0, 1, 0], sizes = [16, 16, 4], strides = [1, 1, 1]} : vector<16x18x4xf32> to vector<16x16x4xf32>
    %12 = vector.extract_strided_slice %0 {offsets = [0, 1, 0], sizes = [1, 1, 4], strides = [1, 1, 1]} : vector<3x3x4xf32> to vector<1x1x4xf32>
    %13 = vector.shape_cast %12 : vector<1x1x4xf32> to vector<4xf32>
    %14 = vector.shape_cast %13 : vector<4xf32> to vector<1x1x4xf32>
    %15 = vector.broadcast %14 : vector<1x1x4xf32> to vector<16x16x4xf32>
    %16 = arith.mulf %11, %15 : vector<16x16x4xf32>
    %17 = arith.addf %10, %16 : vector<16x16x4xf32>
    %18 = vector.extract_strided_slice %3 {offsets = [0, 2, 0], sizes = [16, 16, 4], strides = [1, 1, 1]} : vector<16x18x4xf32> to vector<16x16x4xf32>
    %19 = vector.extract_strided_slice %0 {offsets = [0, 2, 0], sizes = [1, 1, 4], strides = [1, 1, 1]} : vector<3x3x4xf32> to vector<1x1x4xf32>
    %20 = vector.shape_cast %19 : vector<1x1x4xf32> to vector<4xf32>
    %21 = vector.shape_cast %20 : vector<4xf32> to vector<1x1x4xf32>
    %22 = vector.broadcast %21 : vector<1x1x4xf32> to vector<16x16x4xf32>
    %23 = arith.mulf %18, %22 : vector<16x16x4xf32>
    %24 = arith.addf %17, %23 : vector<16x16x4xf32>
    %c0_7 = arith.constant 0 : index
    %c0_8 = arith.constant 0 : index
    %c1 = arith.constant 1 : index
    %c0_9 = arith.constant 0 : index
    %c0_10 = arith.constant 0 : index
    %25 = vector.load %arg3[%c0_7, %c0_8, %c1, %c0_9, %c0_10] : memref<1x1x18x18x4xf32, #tpu.memory_space<vmem>>, vector<1x1x16x18x4xf32>
    %26 = vector.shape_cast %25 : vector<1x1x16x18x4xf32> to vector<16x18x4xf32>
    %27 = vector.extract_strided_slice %26 {offsets = [0, 0, 0], sizes = [16, 16, 4], strides = [1, 1, 1]} : vector<16x18x4xf32> to vector<16x16x4xf32>
    %28 = vector.extract_strided_slice %0 {offsets = [1, 0, 0], sizes = [1, 1, 4], strides = [1, 1, 1]} : vector<3x3x4xf32> to vector<1x1x4xf32>
    %29 = vector.shape_cast %28 : vector<1x1x4xf32> to vector<4xf32>
    %30 = vector.shape_cast %29 : vector<4xf32> to vector<1x1x4xf32>
    %31 = vector.broadcast %30 : vector<1x1x4xf32> to vector<16x16x4xf32>
    %32 = arith.mulf %27, %31 : vector<16x16x4xf32>
    %33 = arith.addf %24, %32 : vector<16x16x4xf32>
    %34 = vector.extract_strided_slice %26 {offsets = [0, 1, 0], sizes = [16, 16, 4], strides = [1, 1, 1]} : vector<16x18x4xf32> to vector<16x16x4xf32>
    %35 = vector.extract_strided_slice %0 {offsets = [1, 1, 0], sizes = [1, 1, 4], strides = [1, 1, 1]} : vector<3x3x4xf32> to vector<1x1x4xf32>
    %36 = vector.shape_cast %35 : vector<1x1x4xf32> to vector<4xf32>
    %37 = vector.shape_cast %36 : vector<4xf32> to vector<1x1x4xf32>
    %38 = vector.broadcast %37 : vector<1x1x4xf32> to vector<16x16x4xf32>
    %39 = arith.mulf %34, %38 : vector<16x16x4xf32>
    %40 = arith.addf %33, %39 : vector<16x16x4xf32>
    %41 = vector.extract_strided_slice %26 {offsets = [0, 2, 0], sizes = [16, 16, 4], strides = [1, 1, 1]} : vector<16x18x4xf32> to vector<16x16x4xf32>
    %42 = vector.extract_strided_slice %0 {offsets = [1, 2, 0], sizes = [1, 1, 4], strides = [1, 1, 1]} : vector<3x3x4xf32> to vector<1x1x4xf32>
    %43 = vector.shape_cast %42 : vector<1x1x4xf32> to vector<4xf32>
    %44 = vector.shape_cast %43 : vector<4xf32> to vector<1x1x4xf32>
    %45 = vector.broadcast %44 : vector<1x1x4xf32> to vector<16x16x4xf32>
    %46 = arith.mulf %41, %45 : vector<16x16x4xf32>
    %47 = arith.addf %40, %46 : vector<16x16x4xf32>
    %c0_11 = arith.constant 0 : index
    %c0_12 = arith.constant 0 : index
    %c2 = arith.constant 2 : index
    %c0_13 = arith.constant 0 : index
    %c0_14 = arith.constant 0 : index
    %48 = vector.load %arg3[%c0_11, %c0_12, %c2, %c0_13, %c0_14] : memref<1x1x18x18x4xf32, #tpu.memory_space<vmem>>, vector<1x1x16x18x4xf32>
    %49 = vector.shape_cast %48 : vector<1x1x16x18x4xf32> to vector<16x18x4xf32>
    %50 = vector.extract_strided_slice %49 {offsets = [0, 0, 0], sizes = [16, 16, 4], strides = [1, 1, 1]} : vector<16x18x4xf32> to vector<16x16x4xf32>
    %51 = vector.extract_strided_slice %0 {offsets = [2, 0, 0], sizes = [1, 1, 4], strides = [1, 1, 1]} : vector<3x3x4xf32> to vector<1x1x4xf32>
    %52 = vector.shape_cast %51 : vector<1x1x4xf32> to vector<4xf32>
    %53 = vector.shape_cast %52 : vector<4xf32> to vector<1x1x4xf32>
    %54 = vector.broadcast %53 : vector<1x1x4xf32> to vector<16x16x4xf32>
    %55 = arith.mulf %50, %54 : vector<16x16x4xf32>
    %56 = arith.addf %47, %55 : vector<16x16x4xf32>
    %57 = vector.extract_strided_slice %49 {offsets = [0, 1, 0], sizes = [16, 16, 4], strides = [1, 1, 1]} : vector<16x18x4xf32> to vector<16x16x4xf32>
    %58 = vector.extract_strided_slice %0 {offsets = [2, 1, 0], sizes = [1, 1, 4], strides = [1, 1, 1]} : vector<3x3x4xf32> to vector<1x1x4xf32>
    %59 = vector.shape_cast %58 : vector<1x1x4xf32> to vector<4xf32>
    %60 = vector.shape_cast %59 : vector<4xf32> to vector<1x1x4xf32>
    %61 = vector.broadcast %60 : vector<1x1x4xf32> to vector<16x16x4xf32>
    %62 = arith.mulf %57, %61 : vector<16x16x4xf32>
    %63 = arith.addf %56, %62 : vector<16x16x4xf32>
    %64 = vector.extract_strided_slice %49 {offsets = [0, 2, 0], sizes = [16, 16, 4], strides = [1, 1, 1]} : vector<16x18x4xf32> to vector<16x16x4xf32>
    %65 = vector.extract_strided_slice %0 {offsets = [2, 2, 0], sizes = [1, 1, 4], strides = [1, 1, 1]} : vector<3x3x4xf32> to vector<1x1x4xf32>
    %66 = vector.shape_cast %65 : vector<1x1x4xf32> to vector<4xf32>
    %67 = vector.shape_cast %66 : vector<4xf32> to vector<1x1x4xf32>
    %68 = vector.broadcast %67 : vector<1x1x4xf32> to vector<16x16x4xf32>
    %69 = arith.mulf %64, %68 : vector<16x16x4xf32>
    %70 = arith.addf %63, %69 : vector<16x16x4xf32>
    %c0_15 = arith.constant 0 : index
    %c0_16 = arith.constant 0 : index
    %71 = vector.load %arg5[%c0_15, %c0_16] : memref<1x4xf32, #tpu.memory_space<vmem>>, vector<1x4xf32>
    %72 = vector.shape_cast %71 : vector<1x4xf32> to vector<4xf32>
    %73 = vector.shape_cast %72 : vector<4xf32> to vector<1x1x4xf32>
    %74 = vector.broadcast %73 : vector<1x1x4xf32> to vector<16x16x4xf32>
    %75 = arith.addf %70, %74 : vector<16x16x4xf32>
    %c0_17 = arith.constant 0 : index
    %c0_18 = arith.constant 0 : index
    %c0_19 = arith.constant 0 : index
    %c0_20 = arith.constant 0 : index
    %76 = vector.load %arg6[%c0_17, %c0_18, %c0_19, %c0_20] : memref<1x16x16x4xf32, #tpu.memory_space<vmem>>, vector<1x16x16x4xf32>
    %77 = vector.shape_cast %76 : vector<1x16x16x4xf32> to vector<16x16x4xf32>
    %78 = vector.shape_cast %75 : vector<16x16x4xf32> to vector<1x16x16x4xf32>
    tpu.vector_store %arg6[%c0_17, %c0_18, %c0_19, %c0_20], %78 {strides = array<i32>} : memref<1x16x16x4xf32, #tpu.memory_space<vmem>>, vector<1x16x16x4xf32>,
    return
  }
  func.func @transform_0(%arg0: i32, %arg1: i32, %arg2: i32) -> (i32, i32, i32, i32, i32) {
    %c0_i32 = arith.constant 0 : i32
    %c0_i32_0 = arith.constant 0 : i32
    %c0_i32_1 = arith.constant 0 : i32
    return %arg0, %arg2, %c0_i32, %c0_i32_0, %arg1 : i32, i32, i32, i32, i32
  }
  func.func @transform_1(%arg0: i32, %arg1: i32, %arg2: i32) -> (i32, i32, i32) {
    %c0_i32 = arith.constant 0 : i32
    %c0_i32_0 = arith.constant 0 : i32
    %c0_i32_1 = arith.constant 0 : i32
    return %c0_i32, %c0_i32_0, %arg1 : i32, i32, i32
  }
  func.func @transform_2(%arg0: i32, %arg1: i32, %arg2: i32) -> (i32, i32) {
    %c0_i32 = arith.constant 0 : i32
    %c0_i32_0 = arith.constant 0 : i32
    return %c0_i32, %arg1 : i32, i32
  }
  func.func @transform_3(%arg0: i32, %arg1: i32, %arg2: i32) -> (i32, i32, i32, i32) {
    %c0_i32 = arith.constant 0 : i32
    %c0_i32_0 = arith.constant 0 : i32
    return %arg0, %arg2, %c0_i32, %arg1 : i32, i32, i32, i32
  }
}

</mosaic_0001>

<bundles_post_ra>
// kernel: dwconv_pallas.1
= control target key start
LH: loop header
LB: loop body
LE: loop exit
PB: predicated region body
PF: predicated region fallthrough
CT: control target
= control target key end

     0   :  { %s2478_s12 = smov 0   ;;  %s2480_s13 = smov 0   ;;  %s3842_s0 = inlined_call_operand.vmem [shape: f32[2,1,18,18,4], index: 0, kind: input, shape index: {}]   ;;  %s3843_s1 = inlined_call_operand.vmem [shape: f32[3,3,4], index: 1, kind: input, shape index: {}]   ;;  %s3844_s2 = inlined_call_operand.vmem [shape: f32[1,4], index: 2, kind: input, shape index: {}]   ;;  %s3845_s3 = inlined_call_operand.vmem [shape: f32[2,16,16,4], index: 3, kind: output, shape index: {}]  }
   0x1   :  { %s2482_s14 = smov 0  }
   0x2 LB: > { %s32_s15 = sadd.s32 1, %s2452_s13  ;;  %p2303_p0 = scmp.ge.s32.totalorder %s2456_s14, 1  ;;  %s2456_s14 = sphi %s2482_s14, %s13_s14   ;;  %s2452_s13 = sphi %s2480_s13, %s3847_s13   ;;  %s2448_s12 = sphi %s2478_s12, %s3846_s12  }
   0x3   : > { %p34_p1 = scmp.ge.s32.totalorder %s32_s15, 2  ;;  %p188_p2 = scmp.lt.s32.totalorder %s2456_s14, 3 }
   0x5   : > { %s3849_s15 = smov (%p34_p1, %s32_s15), 0  ;;  %p189_p3 = pnand %p2303_p0, %p188_p2 }
   0x6   : > { %p234_p4 = scmp.lt.s32.totalorder (!%p189_p3), %s2448_s12, 1  ;;  %v318_v0 = vlaneseq (!%p189_p3)  ;;  %v267_v2 = vld [vmem:[%s3843_s1] sm:$0x7] (!%p189_p3)  ;;  %v268_v3 = vld [vmem:[%s3843_s1 + $0x4] sm:$0x7] (!%p189_p3)  ;;  %vm486_vm0 = vcmask (!%p189_p3), 1046528  }
   0x7   : > { %192 = sbr.rel (%p189_p3) target bundleno = 320 (0x140), region = 32  ;;  %v269_v4 = vld [vmem:[%s3843_s1 + $0x8] sm:$0x7] (!%p189_p3)  ;;  %vm731_vm1 = vcmask (!%p189_p3), 1045504   ;;  %vm2125_vm2 = vcmask (!%p189_p3), 31744  }
   0x8   : > { %v319_v1 = vshrl.u32 (!%p189_p3), %v318_v0, 7 }
   0xa   : > { %v320_v5 = vsub.s32 (!%p189_p3), 0, %v319_v1  ;;  %v388_v6 = vsub.s32 (!%p189_p3), 1, %v319_v1  ;;  %v633_v7 = vsub.s32 (!%p189_p3), 2, %v319_v1 }
   0xc   : > { %v2513_v8 = vrot.slane (!%p189_p3), %v267_v2, %v320_v5  ;;  %v2515_v9 = vrot.slane (!%p189_p3), %v267_v2, %v388_v6  ;;  %v2517_v10 = vrot.slane (!%p189_p3), %v267_v2, %v633_v7  ;;  %v2521_v13 = vrot.slane (!%p189_p3), %v268_v3, %v320_v5 }
   0xd   : > { %v2523_v14 = vrot.slane (!%p189_p3), %v268_v3, %v388_v6  ;;  %v2525_v15 = vrot.slane (!%p189_p3), %v268_v3, %v633_v7  ;;  %v2527_v16 = vrot.slane (!%p189_p3), %v269_v4, %v320_v5  ;;  %v2538_v22 = vrot.slane (!%p189_p3), %v269_v4, %v388_v6 }
   0xe   : > { %s3851_s12 = smov (!%p234_p4, %s2448_s12), 1  ;;  %v2568_v49 = vrot.slane %v269_v4, %v633_v7 }
   0xf   : > { %s2407_s20 = smul.u32 432, %s3851_s12  ;;  %s2406_s26 = sshll.u32 %s3851_s12, 8 }
  0x10   : > { %s2631_s4 = scalar_lea.vmem %s3845_s3, %s2406_s26 }
  0x11   : > { %s2511_s25 = scalar_lea.vmem %s3842_s0, %s2407_s20 }
  0x12   : > { %v270_v11 = vld [vmem:[%s2511_s25] sm:$0xff]  ;;  %v271_v12 = vld [vmem:[%s2511_s25 + $0x8] sm:$0xff]  ;;  %v2533_v20 = vld [vmem:[%s2511_s25 + $0x18] sm:$0xff] }
  0x13   : > { %v390_v17 = vmul.f32 %v2515_v9, %v270_v11  ;;  %v391_v18 = vmul.f32 %v2515_v9, %v271_v12  ;;  %v635_v19 = vmul.f32 %v2517_v10, %v270_v11  ;;  %v2536_v21 = vld [vmem:[%s2511_s25 + $0x20] sm:$0xff]  ;;  %v322_v23 = vmul.f32 %v2513_v8, %v270_v11  ;;  %v2551_v35 = vld [vmem:[%s2511_s25 + $0x30] sm:$0xff]  ;;  %v2561_v44 = vld [vmem:[%s2511_s25 + $0x38] sm:$0xff] }
  0x14   : > { %v636_v24 = vmul.f32 %v2517_v10, %v271_v12  ;;  %v997_v25 = vmul.f32 %v2533_v20, %v2523_v14  ;;  %v998_v26 = vmul.f32 %v2536_v21, %v2523_v14  ;;  %v1241_v30 = vmul.f32 %v2533_v20, %v2525_v15  ;;  %v272_v40 = vld [vmem:[%s2511_s25 + $0x10] sm:$0x3]  ;;  %v2309_v50 = vld [vmem:[%s2511_s25 + $0x28] sm:$0x3]  ;;  %v2357_v3 = vld [vmem:[%s2511_s25 + $0x40] sm:$0x3] }
  0x15   : > { %v487_v27 = vrot.slane %v390_v17, 1  ;;  %v488_v28 = vrot.slane %v391_v18, 1  ;;  %v732_v29 = vrot.slane %v635_v19, 2  ;;  %v1242_v34 = vmul.f32 %v2536_v21, %v2525_v15 }
  0x16   : > { %v733_v31 = vrot.slane %v636_v24, 2  ;;  %v1093_v32 = vrot.slane %v997_v25, 1  ;;  %v1094_v33 = vrot.slane %v998_v26, 1  ;;  %v929_v37 = vmul.f32 %v2533_v20, %v2521_v13 }
  0x17   : > { %v489_v36 = vsel %vm486_vm0, %v487_v27, %v488_v28  ;;  %v1337_v38 = vrot.slane %v1241_v30, 2  ;;  %v1602_v39 = vmul.f32 %v2551_v35, %v2538_v22  ;;  %v1338_v43 = vrot.slane %v1242_v34, 2 }
  0x18   : > { %v599_v41 = vadd.f32 %v489_v36, %v322_v23  ;;  %v734_v42 = vsel %vm731_vm1, %v732_v29, %v733_v31  ;;  %v1534_v45 = vmul.f32 %v2551_v35, %v2527_v16  ;;  %v1095_v46 = vsel %vm486_vm0, %v1093_v32, %v1094_v33 }
  0x19   : > { %v1603_v47 = vmul.f32 %v2561_v44, %v2538_v22  ;;  %v1698_v48 = vrot.slane %v1602_v39, 1  ;;  %v323_v52 = vmul.f32 %v2513_v8, %v271_v12  ;;  %v392_v53 = vmul.f32 %v2515_v9, %v272_v40 }
  0x1a   : > { %v844_v51 = vadd.f32 %v734_v42, %v599_v41  ;;  %v637_v54 = vmul.f32 %v2517_v10, %v272_v40  ;;  %v1339_v55 = vsel %vm731_vm1, %v1337_v38, %v1338_v43  ;;  %v1846_v57 = vmul.f32 %v2551_v35, %v2568_v49 }
  0x1b   : > { %v1699_v56 = vrot.slane %v1603_v47, 1  ;;  %v1847_v58 = vmul.f32 %v2561_v44, %v2568_v49  ;;  %v490_v60 = vrot.slane %v392_v53, 1  ;;  %v999_v62 = vmul.f32 %v2309_v50, %v2523_v14 }
  0x1c   : > { %v961_v59 = vadd.f32 %v929_v37, %v844_v51  ;;  %v735_v61 = vrot.slane %v637_v54, 2  ;;  %v1942_v63 = vrot.slane %v1846_v57, 2  ;;  %v930_v1 = vmul.f32 %v2536_v21, %v2521_v13 }
  0x1d   : > { %v1943_v0 = vrot.slane %v1847_v58, 2  ;;  %v1243_v2 = vmul.f32 %v2309_v50, %v2525_v15  ;;  %v491_v5 = vsel %vm486_vm0, %v488_v28, %v490_v60  ;;  %v1096_v7 = vrot.slane %v999_v62, 1 }
  0x1e   : > { %v1205_v4 = vadd.f32 %v1095_v46, %v961_v59  ;;  %v736_v6 = vsel %vm731_vm1, %v733_v31, %v735_v61  ;;  %v1700_v11 = vsel %vm486_vm0, %v1698_v48, %v1699_v56  ;;  %v600_v17 = vadd.f32 %v491_v5, %v323_v52 }
  0x1f   : > { %v1944_v12 = vsel %vm731_vm1, %v1942_v63, %v1943_v0  ;;  %v1340_v18 = vrot.slane %v1243_v2, 2  ;;  %v1535_v23 = vmul.f32 %v2561_v44, %v2527_v16  ;;  %v1604_v24 = vmul.f32 %v2357_v3, %v2538_v22  ;;  %v2642_v2 = vld [vmem:[%s2511_s25 + $0x48] sm:$0xff] }
  0x20   : > { %v1449_v19 = vadd.f32 %v1339_v55, %v1205_v4  ;;  %v1848_v25 = vmul.f32 %v2357_v3, %v2568_v49  ;;  %v845_v26 = vadd.f32 %v736_v6, %v600_v17  ;;  %v1097_v27 = vsel %vm486_vm0, %v1094_v33, %v1096_v7  ;;  %v2645_v3 = vld [vmem:[%s2511_s25 + $0x50] sm:$0xff] }
  0x21   : > { %v1341_v28 = vsel %vm731_vm1, %v1338_v43, %v1340_v18  ;;  %v393_v29 = vmul.f32 %v2533_v20, %v2515_v9  ;;  %v1701_v31 = vrot.slane %v1604_v24, 1  ;;  %v324_v32 = vmul.f32 %v2533_v20, %v2513_v8  ;;  %v2614_v43 = vld [vmem:[%s3844_s2] ss:$0 sm:$0xff]  ;;  %v275_v18 = vld [vmem:[%s2511_s25 + $0x28] sm:$0x3] }
  0x22   : > { %v1566_v30 = vadd.f32 %v1534_v45, %v1449_v19  ;;  %v2600_v34 = vmul.f32 %v2536_v21, %v2515_v9  ;;  %v962_v36 = vadd.f32 %v930_v1, %v845_v26  ;;  %v638_v38 = vmul.f32 %v2533_v20, %v2517_v10  ;;  %v2312_v26 = vld [vmem:[%s2511_s25 + $0x40] sm:$0x3] }
  0x23   : > { %v492_v37 = vrot.slane %v393_v29, 1  ;;  %v2606_v33 = vmul.f32 %v2536_v21, %v2517_v10  ;;  %v1702_v40 = vsel %vm486_vm0, %v1699_v56, %v1701_v31  ;;  %v1945_v41 = vrot.slane %v1848_v25, 2 }
  0x24   : > { %v1810_v39 = vadd.f32 %v1700_v11, %v1566_v30  ;;  %v493_v42 = vrot.slane %v2600_v34, 1  ;;  %v1206_v45 = vadd.f32 %v1097_v27, %v962_v36  ;;  %v737_v46 = vrot.slane %v638_v38, 2  ;;  %v2360_v38 = vld [vmem:[%s2511_s25 + $0x58] sm:$0x3] }
  0x25   : > { %v738_v20 = vrot.slane %v2606_v33, 2  ;;  %v931_v47 = vmul.f32 %v2551_v35, %v2521_v13  ;;  %v1000_v51 = vmul.f32 %v2551_v35, %v2523_v14  ;;  %v2626_v52 = vmul.f32 %v2561_v44, %v2523_v14 }
  0x26   : > { %v2054_v48 = vadd.f32 %v1944_v12, %v1810_v39  ;;  %v494_v50 = vsel %vm486_vm0, %v492_v37, %v493_v42  ;;  %v1450_v53 = vadd.f32 %v1341_v28, %v1206_v45  ;;  %v1244_v56 = vmul.f32 %v2551_v35, %v2525_v15 }
  0x27   : > { %v601_v54 = vadd.f32 %v494_v50, %v324_v32  ;;  %v739_v55 = vsel %vm731_vm1, %v737_v46, %v738_v20  ;;  %v1098_v58 = vrot.slane %v1000_v51, 1  ;;  %v1099_v59 = vrot.slane %v2626_v52, 1 }
  0x28   : > { %v2093_v57 = vadd.f32 %v2614_v43, %v2054_v48  ;;  %v1245_v60 = vmul.f32 %v2561_v44, %v2525_v15  ;;  %v1567_v61 = vadd.f32 %v1535_v23, %v1450_v53  ;;  %v1946_v62 = vsel %vm731_vm1, %v1943_v0, %v1945_v41 }
  0x29   : > { %v846_v63 = vadd.f32 %v739_v55, %v601_v54  ;;  %v1342_v1 = vrot.slane %v1244_v56, 2  ;;  %v1100_v4 = vsel %vm486_vm0, %v1098_v58, %v1099_v59  ;;  %v1605_v6 = vmul.f32 %v2642_v2, %v2538_v22 }
  0x2a   : > { %2126 = vst.msk [vmem:[%s2631_s4] sm:$0xff] %vm2125_vm2, %v2093_v57  ;;  %v1343_v5 = vrot.slane %v1245_v60, 2  ;;  %v1606_v7 = vmul.f32 %v2645_v3, %v2538_v22  ;;  %v1811_v11 = vadd.f32 %v1702_v40, %v1567_v61  ;;  %v1849_v12 = vmul.f32 %v2642_v2, %v2568_v49 }
  0x2b   : > { %v963_v0 = vadd.f32 %v931_v47, %v846_v63  ;;  %v2658_v17 = vmul.f32 %v2645_v3, %v2568_v49  ;;  %v1536_v23 = vmul.f32 %v2642_v2, %v2527_v16  ;;  %v1703_v24 = vrot.slane %v1605_v6, 1 }
  0x2c   : > { %v1344_v19 = vsel %vm731_vm1, %v1342_v1, %v1343_v5  ;;  %v1704_v25 = vrot.slane %v1606_v7, 1  ;;  %v2055_v27 = vadd.f32 %v1946_v62, %v1811_v11  ;;  %v1947_v29 = vrot.slane %v1849_v12, 2 }
  0x2d   : > { %v1207_v28 = vadd.f32 %v1100_v4, %v963_v0  ;;  %v1948_v30 = vrot.slane %v2658_v17, 2  ;;  %v325_v32 = vmul.f32 %v2536_v21, %v2513_v8  ;;  %v395_v36 = vmul.f32 %v2515_v9, %v275_v18 }
  0x2e   : > { %v1705_v31 = vsel %vm486_vm0, %v1703_v24, %v1704_v25  ;;  %v640_v37 = vmul.f32 %v2517_v10, %v275_v18  ;;  %v2094_v33 = vadd.f32 %v2614_v43, %v2055_v27  ;;  %v932_v40 = vmul.f32 %v2561_v44, %v2521_v13 }
  0x2f   : > { %v1451_v39 = vadd.f32 %v1344_v19, %v1207_v28  ;;  %v1002_v41 = vmul.f32 %v2312_v26, %v2523_v14  ;;  %v1949_v45 = vsel %vm731_vm1, %v1947_v29, %v1948_v30  ;;  %v495_v46 = vrot.slane %v395_v36, 1 }
  0x30   : > { %v740_v47 = vrot.slane %v640_v37, 2  ;;  %v1246_v48 = vmul.f32 %v2312_v26, %v2525_v15  ;;  %2127 = vst.msk [vmem:[%s2631_s4 + $0x8] sm:$0xff] %vm2125_vm2, %v2094_v33  ;;  %v1607_v51 = vmul.f32 %v2360_v38, %v2538_v22  ;;  %v1851_v52 = vmul.f32 %v2360_v38, %v2568_v49 }
  0x31   : > { %v1568_v21 = vadd.f32 %v1536_v23, %v1451_v39  ;;  %v1101_v50 = vrot.slane %v1002_v41, 1  ;;  %v496_v53 = vsel %vm486_vm0, %v493_v42, %v495_v46  ;;  %v1537_v56 = vmul.f32 %v2645_v3, %v2527_v16  ;;  %v2724_v41 = vld [vmem:[%s2511_s25 + $0x68] sm:$0xff] }
  0x32   : > { %v741_v54 = vsel %vm731_vm1, %v738_v20, %v740_v47  ;;  %v1345_v55 = vrot.slane %v1246_v48, 2  ;;  %v602_v58 = vadd.f32 %v496_v53, %v325_v32  ;;  %v1706_v60 = vrot.slane %v1607_v51, 1  ;;  %v278_v48 = vld [vmem:[%s2511_s25 + $0x40] sm:$0x3]  ;;  %v2315_v53 = vld [vmem:[%s2511_s25 + $0x58] sm:$0x3] }
  0x33   : > { %v1812_v57 = vadd.f32 %v1705_v31, %v1568_v21  ;;  %v326_v61 = vmul.f32 %v2551_v35, %v2513_v8  ;;  %v1102_v62 = vsel %vm486_vm0, %v1099_v59, %v1101_v50  ;;  %v396_v34 = vmul.f32 %v2551_v35, %v2515_v9 }
  0x34   : > { %v1346_v63 = vsel %vm731_vm1, %v1343_v5, %v1345_v55  ;;  %v2696_v42 = vmul.f32 %v2561_v44, %v2515_v9  ;;  %v847_v1 = vadd.f32 %v741_v54, %v602_v58  ;;  %v1950_v4 = vrot.slane %v1851_v52, 2 }
  0x35   : > { %v2056_v20 = vadd.f32 %v1949_v45, %v1812_v57  ;;  %v641_v6 = vmul.f32 %v2551_v35, %v2517_v10  ;;  %v1707_v7 = vsel %vm486_vm0, %v1704_v25, %v1706_v60  ;;  %v497_v11 = vrot.slane %v396_v34, 1 }
  0x36   : > { %v498_v59 = vrot.slane %v2696_v42, 1  ;;  %v642_v5 = vmul.f32 %v2561_v44, %v2517_v10  ;;  %v964_v12 = vadd.f32 %v932_v40, %v847_v1  ;;  %v933_v18 = vmul.f32 %v2642_v2, %v2521_v13  ;;  %v2721_v40 = vld [vmem:[%s2511_s25 + $0x60] sm:$0xff]  ;;  %v2363_v1 = vld [vmem:[%s2511_s25 + $0x70] sm:$0x3] }
  0x37   : > { %v2095_v0 = vadd.f32 %v2614_v43, %v2056_v20  ;;  %v742_v17 = vrot.slane %v641_v6, 2  ;;  %v1003_v35 = vmul.f32 %v2642_v2, %v2523_v14  ;;  %v1004_v24 = vmul.f32 %v2645_v3, %v2523_v14 }
  0x38   : > { %v499_v19 = vsel %vm486_vm0, %v497_v11, %v498_v59  ;;  %v743_v23 = vrot.slane %v642_v5, 2  ;;  %v1208_v25 = vadd.f32 %v1102_v62, %v964_v12  ;;  %v1247_v27 = vmul.f32 %v2642_v2, %v2525_v15 }
  0x39   : > { %2128 = vst.msk [vmem:[%s2631_s4 + $0x10] sm:$0xff] %vm2125_vm2, %v2095_v0  ;;  %v603_v26 = vadd.f32 %v499_v19, %v326_v61  ;;  %v1248_v28 = vmul.f32 %v2645_v3, %v2525_v15  ;;  %v1951_v29 = vsel %vm731_vm1, %v1948_v30, %v1950_v4  ;;  %v1103_v32 = vrot.slane %v1003_v35, 1 }
  0x3a   : > { %v744_v31 = vsel %vm731_vm1, %v742_v17, %v743_v23  ;;  %v1104_v36 = vrot.slane %v1004_v24, 1  ;;  %v1452_v37 = vadd.f32 %v1346_v63, %v1208_v25  ;;  %v1347_v33 = vrot.slane %v1247_v27, 2 }
  0x3b   : > { %v848_v38 = vadd.f32 %v744_v31, %v603_v26  ;;  %v1348_v39 = vrot.slane %v1248_v28, 2  ;;  %v1608_v46 = vmul.f32 %v2721_v40, %v2538_v22  ;;  %v1609_v30 = vmul.f32 %v2724_v41, %v2538_v22 }
  0x3c   : > { %v1105_v45 = vsel %vm486_vm0, %v1103_v32, %v1104_v36  ;;  %v1852_v47 = vmul.f32 %v2721_v40, %v2568_v49  ;;  %v1569_v21 = vadd.f32 %v1537_v56, %v1452_v37  ;;  %v1538_v51 = vmul.f32 %v2721_v40, %v2527_v16 }
  0x3d   : > { %v965_v50 = vadd.f32 %v933_v18, %v848_v38  ;;  %v2738_v52 = vmul.f32 %v2724_v41, %v2568_v49  ;;  %v1349_v54 = vsel %vm731_vm1, %v1347_v33, %v1348_v39  ;;  %v1708_v55 = vrot.slane %v1608_v46, 1 }
  0x3e   : > { %v1709_v57 = vrot.slane %v1609_v30, 1  ;;  %v1952_v58 = vrot.slane %v1852_v47, 2  ;;  %v1813_v60 = vadd.f32 %v1707_v7, %v1569_v21  ;;  %v398_v56 = vmul.f32 %v2515_v9, %v278_v48 }
  0x3f   : > { %v1209_v61 = vadd.f32 %v1105_v45, %v965_v50  ;;  %v1953_v62 = vrot.slane %v2738_v52, 2  ;;  %v327_v34 = vmul.f32 %v2561_v44, %v2513_v8  ;;  %v643_v42 = vmul.f32 %v2517_v10, %v278_v48 }
  0x40   : > { %v1710_v63 = vsel %vm486_vm0, %v1708_v55, %v1709_v57  ;;  %v1005_v20 = vmul.f32 %v2315_v53, %v2523_v14  ;;  %v2057_v4 = vadd.f32 %v1951_v29, %v1813_v60  ;;  %v500_v11 = vrot.slane %v398_v56, 1 }
  0x41   : > { %v1453_v6 = vadd.f32 %v1349_v54, %v1209_v61  ;;  %v934_v7 = vmul.f32 %v2645_v3, %v2521_v13  ;;  %v1954_v5 = vsel %vm731_vm1, %v1952_v58, %v1953_v62  ;;  %v745_v0 = vrot.slane %v643_v42, 2 }
  0x42   : > { %v1106_v12 = vrot.slane %v1005_v20, 1  ;;  %v1249_v17 = vmul.f32 %v2315_v53, %v2525_v15  ;;  %v2096_v44 = vadd.f32 %v2614_v43, %v2057_v4  ;;  %v501_v19 = vsel %vm486_vm0, %v498_v59, %v500_v11  ;;  %v2799_v11 = vld [vmem:[%s2511_s25 + $0x78] sm:$0xff] }
  0x43   : > { %v1570_v18 = vadd.f32 %v1538_v51, %v1453_v6  ;;  %v1610_v35 = vmul.f32 %v2363_v1, %v2538_v22  ;;  %v604_v24 = vadd.f32 %v501_v19, %v327_v34  ;;  %v746_v25 = vsel %vm731_vm1, %v743_v23, %v745_v0 }
  0x44   : > { %v1350_v26 = vrot.slane %v1249_v17, 2  ;;  %v1539_v27 = vmul.f32 %v2724_v41, %v2527_v16  ;;  %2129 = vst.msk [vmem:[%s2631_s4 + $0x18] sm:$0xff] %vm2125_vm2, %v2096_v44  ;;  %v1107_v29 = vsel %vm486_vm0, %v1104_v36, %v1106_v12  ;;  %v1854_v32 = vmul.f32 %v2363_v1, %v2568_v49  ;;  %v281_v17 = vld [vmem:[%s2511_s25 + $0x58] sm:$0x3] }
  0x45   : > { %v1814_v28 = vadd.f32 %v1710_v63, %v1570_v18  ;;  %v1711_v31 = vrot.slane %v1610_v35, 1  ;;  %v849_v37 = vadd.f32 %v746_v25, %v604_v24  ;;  %v328_v59 = vmul.f32 %v2642_v2, %v2513_v8 }
  0x46   : > { %v399_v38 = vmul.f32 %v2642_v2, %v2515_v9  ;;  %v2770_v23 = vmul.f32 %v2645_v3, %v2515_v9  ;;  %v1351_v45 = vsel %vm731_vm1, %v1348_v39, %v1350_v26  ;;  %v1955_v46 = vrot.slane %v1854_v32, 2 }
  0x47   : > { %v2058_v33 = vadd.f32 %v1954_v5, %v1814_v28  ;;  %v644_v36 = vmul.f32 %v2642_v2, %v2517_v10  ;;  %v966_v30 = vadd.f32 %v934_v7, %v849_v37  ;;  %v2778_v21 = vmul.f32 %v2645_v3, %v2517_v10  ;;  %v2802_v7 = vld [vmem:[%s2511_s25 + $0x80] sm:$0xff]  ;;  %v2318_v28 = vld [vmem:[%s2511_s25 + $0x70] sm:$0x3] }
  0x48   : > { %v502_v47 = vrot.slane %v399_v38, 1  ;;  %v503_v48 = vrot.slane %v2770_v23, 1  ;;  %v1712_v51 = vsel %vm486_vm0, %v1709_v57, %v1711_v31  ;;  %v935_v39 = vmul.f32 %v2721_v40, %v2521_v13 }
  0x49   : > { %v2097_v50 = vadd.f32 %v2614_v43, %v2058_v33  ;;  %v747_v52 = vrot.slane %v644_v36, 2  ;;  %v1210_v53 = vadd.f32 %v1107_v29, %v966_v30  ;;  %v748_v2 = vrot.slane %v2778_v21, 2 }
  0x4a   : > { %v504_v54 = vsel %vm486_vm0, %v502_v47, %v503_v48  ;;  %v1006_v55 = vmul.f32 %v2721_v40, %v2523_v14  ;;  %v1007_v57 = vmul.f32 %v2724_v41, %v2523_v14  ;;  %v1250_v60 = vmul.f32 %v2721_v40, %v2525_v15 }
  0x4b   : > { %2130 = vst.msk [vmem:[%s2631_s4 + $0x20] sm:$0xff] %vm2125_vm2, %v2097_v50  ;;  %v605_v58 = vadd.f32 %v504_v54, %v328_v59  ;;  %v1251_v61 = vmul.f32 %v2724_v41, %v2525_v15  ;;  %v1454_v56 = vadd.f32 %v1351_v45, %v1210_v53  ;;  %v1956_v63 = vsel %vm731_vm1, %v1953_v62, %v1955_v46  ;;  %v2366_v45 = vld [vmem:[%s2511_s25 + $0x88] sm:$0x3] }
  0x4c   : > { %v749_v34 = vsel %vm731_vm1, %v747_v52, %v748_v2  ;;  %v1108_v42 = vrot.slane %v1006_v55, 1  ;;  %v1109_v1 = vrot.slane %v1007_v57, 1  ;;  %v1352_v4 = vrot.slane %v1250_v60, 2 }
  0x4d   : > { %v850_v20 = vadd.f32 %v749_v34, %v605_v58  ;;  %v1353_v6 = vrot.slane %v1251_v61, 2  ;;  %v1571_v5 = vadd.f32 %v1539_v27, %v1454_v56  ;;  %v1611_v0 = vmul.f32 %v2799_v11, %v2538_v22 }
  0x4e   : > { %v1612_v12 = vmul.f32 %v2802_v7, %v2538_v22  ;;  %v1855_v62 = vmul.f32 %v2799_v11, %v2568_v49  ;;  %v1110_v18 = vsel %vm486_vm0, %v1108_v42, %v1109_v1  ;;  %v2815_v35 = vmul.f32 %v2802_v7, %v2568_v49 }
  0x4f   : > { %v967_v44 = vadd.f32 %v935_v39, %v850_v20  ;;  %v1354_v19 = vsel %vm731_vm1, %v1352_v4, %v1353_v6  ;;  %v1815_v24 = vadd.f32 %v1712_v51, %v1571_v5  ;;  %v1713_v25 = vrot.slane %v1611_v0, 1 }
  0x50   : > { %v1714_v26 = vrot.slane %v1612_v12, 1  ;;  %v1957_v27 = vrot.slane %v1855_v62, 2  ;;  %v1540_v31 = vmul.f32 %v2799_v11, %v2527_v16  ;;  %v1958_v32 = vrot.slane %v2815_v35, 2 }
  0x51   : > { %v1211_v29 = vadd.f32 %v1110_v18, %v967_v44  ;;  %v401_v37 = vmul.f32 %v2515_v9, %v281_v17  ;;  %v2059_v59 = vadd.f32 %v1956_v63, %v1815_v24  ;;  %v329_v23 = vmul.f32 %v2645_v3, %v2513_v8 }
  0x52   : > { %v1715_v38 = vsel %vm486_vm0, %v1713_v25, %v1714_v26  ;;  %v646_v33 = vmul.f32 %v2517_v10, %v281_v17  ;;  %v936_v30 = vmul.f32 %v2724_v41, %v2521_v13  ;;  %v1008_v47 = vmul.f32 %v2318_v28, %v2523_v14 }
  0x53   : > { %v1455_v46 = vadd.f32 %v1354_v19, %v1211_v29  ;;  %v505_v36 = vrot.slane %v401_v37, 1  ;;  %v2098_v21 = vadd.f32 %v2614_v43, %v2059_v59  ;;  %v1959_v50 = vsel %vm731_vm1, %v1957_v27, %v1958_v32 }
  0x54   : > { %v750_v51 = vrot.slane %v646_v33, 2  ;;  %v1252_v52 = vmul.f32 %v2318_v28, %v2525_v15  ;;  %v1111_v53 = vrot.slane %v1008_v47, 1  ;;  %v1613_v54 = vmul.f32 %v2366_v45, %v2538_v22  ;;  %v2872_v33 = vld [vmem:[%s2511_s25 + $0x90] sm:$0xff] }
  0x55   : > { %v1572_v3 = vadd.f32 %v1540_v31, %v1455_v46  ;;  %v506_v39 = vsel %vm486_vm0, %v503_v48, %v505_v36  ;;  %2131 = vst.msk [vmem:[%s2631_s4 + $0x28] sm:$0xff] %vm2125_vm2, %v2098_v21  ;;  %v1857_v60 = vmul.f32 %v2366_v45, %v2568_v49  ;;  %v1541_v56 = vmul.f32 %v2802_v7, %v2527_v16 }
  0x56   : > { %v606_v55 = vadd.f32 %v506_v39, %v329_v23  ;;  %v751_v58 = vsel %vm731_vm1, %v748_v2, %v750_v51  ;;  %v1355_v57 = vrot.slane %v1252_v52, 2  ;;  %v1716_v63 = vrot.slane %v1613_v54, 1 }
  0x57   : > { %v1816_v61 = vadd.f32 %v1715_v38, %v1572_v3  ;;  %v1112_v42 = vsel %vm486_vm0, %v1109_v1, %v1111_v53  ;;  %v330_v48 = vmul.f32 %v2721_v40, %v2513_v8  ;;  %v402_v20 = vmul.f32 %v2721_v40, %v2515_v9  ;;  %v284_v3 = vld [vmem:[%s2511_s25 + $0x70] sm:$0x3] }
  0x58   : > { %v851_v34 = vadd.f32 %v751_v58, %v606_v55  ;;  %v1356_v2 = vsel %vm731_vm1, %v1353_v6, %v1355_v57  ;;  %v403_v5 = vmul.f32 %v2724_v41, %v2515_v9  ;;  %v647_v0 = vmul.f32 %v2721_v40, %v2517_v10 }
  0x59   : > { %v2060_v4 = vadd.f32 %v1959_v50, %v1816_v61  ;;  %v1960_v62 = vrot.slane %v1857_v60, 2  ;;  %v507_v17 = vrot.slane %v402_v20, 1  ;;  %v648_v1 = vmul.f32 %v2724_v41, %v2517_v10 }
  0x5a   : > { %v968_v12 = vadd.f32 %v936_v30, %v851_v34  ;;  %v1717_v18 = vsel %vm486_vm0, %v1714_v26, %v1716_v63  ;;  %v508_v19 = vrot.slane %v403_v5, 1  ;;  %v752_v24 = vrot.slane %v647_v0, 2  ;;  %v2875_v30 = vld [vmem:[%s2511_s25 + $0x98] sm:$0xff] }
  0x5b   : > { %v2099_v44 = vadd.f32 %v2614_v43, %v2060_v4  ;;  %v753_v25 = vrot.slane %v648_v1, 2  ;;  %v1009_v27 = vmul.f32 %v2799_v11, %v2523_v14  ;;  %v1010_v40 = vmul.f32 %v2802_v7, %v2523_v14 }
  0x5c   : > { %v1212_v6 = vadd.f32 %v1112_v42, %v968_v12  ;;  %v509_v28 = vsel %vm486_vm0, %v507_v17, %v508_v19  ;;  %v937_v29 = vmul.f32 %v2799_v11, %v2521_v13  ;;  %v1253_v26 = vmul.f32 %v2799_v11, %v2525_v15 }
  0x5d   : > { %2132 = vst.msk [vmem:[%s2631_s4 + $0x30] sm:$0xff] %vm2125_vm2, %v2099_v44  ;;  %v1254_v31 = vmul.f32 %v2802_v7, %v2525_v15  ;;  %v607_v59 = vadd.f32 %v509_v28, %v330_v48  ;;  %v754_v38 = vsel %vm731_vm1, %v752_v24, %v753_v25  ;;  %v1113_v23 = vrot.slane %v1009_v27, 1 }
  0x5e   : > { %v1456_v37 = vadd.f32 %v1356_v2, %v1212_v6  ;;  %v1114_v45 = vrot.slane %v1010_v40, 1  ;;  %v1357_v46 = vrot.slane %v1253_v26, 2  ;;  %v1614_v47 = vmul.f32 %v2872_v33, %v2538_v22  ;;  %v2369_v2 = vld [vmem:[%s2511_s25 + $0xa0] sm:$0x3] }
  0x5f   : > { %v1358_v36 = vrot.slane %v1254_v31, 2  ;;  %v852_v50 = vadd.f32 %v754_v38, %v607_v59  ;;  %v2881_v51 = vmul.f32 %v2875_v30, %v2538_v22  ;;  %v1858_v52 = vmul.f32 %v2872_v33, %v2568_v49 }
  0x60   : > { %v1573_v21 = vadd.f32 %v1541_v56, %v1456_v37  ;;  %v1961_v39 = vsel %vm731_vm1, %v1958_v32, %v1960_v62  ;;  %v1115_v53 = vsel %vm486_vm0, %v1113_v23, %v1114_v45  ;;  %v1718_v54 = vrot.slane %v1614_v47, 1  ;;  %v2321_v56 = vld [vmem:[%s2511_s25 + $0x88] sm:$0x3] }
  0x61   : > { %v2892_v55 = vmul.f32 %v2875_v30, %v2568_v49  ;;  %v969_v57 = vadd.f32 %v937_v29, %v852_v50  ;;  %v1542_v60 = vmul.f32 %v2872_v33, %v2527_v16  ;;  %v1719_v61 = vrot.slane %v2881_v51, 1 }
  0x62   : > { %v1817_v58 = vadd.f32 %v1717_v18, %v1573_v21  ;;  %v1359_v35 = vsel %vm731_vm1, %v1357_v46, %v1358_v36  ;;  %v1962_v63 = vrot.slane %v1858_v52, 2  ;;  %v404_v32 = vmul.f32 %v2515_v9, %v284_v3 }
  0x63   : > { %v649_v34 = vmul.f32 %v2517_v10, %v284_v3  ;;  %v1213_v48 = vadd.f32 %v1115_v53, %v969_v57  ;;  %v1963_v20 = vrot.slane %v2892_v55, 2  ;;  %v331_v4 = vmul.f32 %v2724_v41, %v2513_v8 }
  0x64   : > { %v2061_v42 = vadd.f32 %v1961_v39, %v1817_v58  ;;  %v1720_v5 = vsel %vm486_vm0, %v1718_v54, %v1719_v61  ;;  %v510_v0 = vrot.slane %v404_v32, 1  ;;  %v1011_v62 = vmul.f32 %v2321_v56, %v2523_v14 }
  0x65   : > { %v755_v12 = vrot.slane %v649_v34, 2  ;;  %v1457_v1 = vadd.f32 %v1359_v35, %v1213_v48  ;;  %v938_v44 = vmul.f32 %v2802_v7, %v2521_v13  ;;  %v1255_v18 = vmul.f32 %v2321_v56, %v2525_v15 }
  0x66   : > { %v2100_v17 = vadd.f32 %v2614_v43, %v2061_v42  ;;  %v511_v24 = vsel %vm486_vm0, %v508_v19, %v510_v0  ;;  %v1116_v6 = vrot.slane %v1011_v62, 1  ;;  %v1616_v27 = vmul.f32 %v2369_v2, %v2538_v22 }
  0x67   : > { %v756_v41 = vsel %vm731_vm1, %v753_v25, %v755_v12  ;;  %v1574_v40 = vadd.f32 %v1542_v60, %v1457_v1  ;;  %v608_v28 = vadd.f32 %v511_v24, %v331_v4  ;;  %v1360_v29 = vrot.slane %v1255_v18, 2 }
  0x68   : > { %2133 = vst.msk [vmem:[%s2631_s4 + $0x38] sm:$0xff] %vm2125_vm2, %v2100_v17  ;;  %v1860_v26 = vmul.f32 %v2369_v2, %v2568_v49  ;;  %v1964_v31 = vsel %vm731_vm1, %v1962_v63, %v1963_v20  ;;  %v1117_v37 = vsel %vm486_vm0, %v1114_v45, %v1116_v6  ;;  %v1543_v59 = vmul.f32 %v2875_v30, %v2527_v16  ;;  %v2959_v17 = vld [vmem:[%s2511_s25 + $0xb0] sm:$0xff]  ;;  %v287_v6 = vld [vmem:[%s2511_s25 + $0x88] sm:$0x3] }
  0x69   : > { %v405_v19 = vmul.f32 %v2799_v11, %v2515_v9  ;;  %v1818_v25 = vadd.f32 %v1720_v5, %v1574_v40  ;;  %v853_v38 = vadd.f32 %v756_v41, %v608_v28  ;;  %v1721_v23 = vrot.slane %v1616_v27, 1  ;;  %v2953_v5 = vld [vmem:[%s2511_s25 + $0xa8] sm:$0xff] }
  0x6a   : > { %v332_v46 = vmul.f32 %v2799_v11, %v2513_v8  ;;  %v1361_v47 = vsel %vm731_vm1, %v1358_v36, %v1360_v29  ;;  %v2930_v21 = vmul.f32 %v2802_v7, %v2515_v9  ;;  %v650_v45 = vmul.f32 %v2799_v11, %v2517_v10 }
  0x6b   : > { %v512_v50 = vrot.slane %v405_v19, 1  ;;  %v2062_v52 = vadd.f32 %v1964_v31, %v1818_v25  ;;  %v970_v3 = vadd.f32 %v938_v44, %v853_v38  ;;  %v1965_v39 = vrot.slane %v1860_v26, 2  ;;  %v2324_v31 = vld [vmem:[%s2511_s25 + $0xa0] sm:$0x3] }
  0x6c   : > { %v651_v53 = vmul.f32 %v2802_v7, %v2517_v10  ;;  %v513_v54 = vrot.slane %v2930_v21, 1  ;;  %v757_v55 = vrot.slane %v650_v45, 2  ;;  %v939_v36 = vmul.f32 %v2872_v33, %v2521_v13  ;;  %v2372_v21 = vld [vmem:[%s2511_s25 + $0xb8] sm:$0x3] }
  0x6d   : > { %v1012_v58 = vmul.f32 %v2872_v33, %v2523_v14  ;;  %v2101_v57 = vadd.f32 %v2614_v43, %v2062_v52  ;;  %v1214_v11 = vadd.f32 %v1117_v37, %v970_v3  ;;  %v1013_v56 = vmul.f32 %v2875_v30, %v2523_v14 }
  0x6e   : > { %v758_v60 = vrot.slane %v651_v53, 2  ;;  %v514_v35 = vsel %vm486_vm0, %v512_v50, %v513_v54  ;;  %v1256_v32 = vmul.f32 %v2872_v33, %v2525_v15  ;;  %v1257_v34 = vmul.f32 %v2875_v30, %v2525_v15 }
  0x6f   : > { %v1118_v63 = vrot.slane %v1012_v58, 1  ;;  %2134 = vst.msk [vmem:[%s2631_s4 + $0x40] sm:$0xff] %vm2125_vm2, %v2101_v57  ;;  %v1458_v42 = vadd.f32 %v1361_v47, %v1214_v11  ;;  %v609_v48 = vadd.f32 %v514_v35, %v332_v46  ;;  %v1119_v2 = vrot.slane %v1013_v56, 1 }
  0x70   : > { %v759_v4 = vsel %vm731_vm1, %v757_v55, %v758_v60  ;;  %v1722_v0 = vsel %vm486_vm0, %v1719_v61, %v1721_v23  ;;  %v1362_v12 = vrot.slane %v1256_v32, 2  ;;  %v1363_v62 = vrot.slane %v1257_v34, 2 }
  0x71   : > { %v1617_v1 = vmul.f32 %v2953_v5, %v2538_v22  ;;  %v1575_v44 = vadd.f32 %v1543_v59, %v1458_v42  ;;  %v1966_v18 = vsel %vm731_vm1, %v1963_v20, %v1965_v39  ;;  %v854_v24 = vadd.f32 %v759_v4, %v609_v48 }
  0x72   : > { %v2966_v41 = vmul.f32 %v2959_v17, %v2538_v22  ;;  %v1120_v51 = vsel %vm486_vm0, %v1118_v63, %v1119_v2  ;;  %v1861_v27 = vmul.f32 %v2953_v5, %v2568_v49  ;;  %v2974_v40 = vmul.f32 %v2959_v17, %v2568_v49 }
  0x73   : > { %v1723_v61 = vrot.slane %v1617_v1, 1  ;;  %v1819_v28 = vadd.f32 %v1722_v0, %v1575_v44  ;;  %v971_v29 = vadd.f32 %v939_v36, %v854_v24  ;;  %v1544_v20 = vmul.f32 %v2953_v5, %v2527_v16 }
  0x74   : > { %v1724_v26 = vrot.slane %v2966_v41, 1  ;;  %v1364_v37 = vsel %vm731_vm1, %v1362_v12, %v1363_v62  ;;  %v333_v59 = vmul.f32 %v2802_v7, %v2513_v8  ;;  %v407_v19 = vmul.f32 %v2515_v9, %v287_v6 }
  0x75   : > { %v652_v25 = vmul.f32 %v2517_v10, %v287_v6  ;;  %v2063_v38 = vadd.f32 %v1966_v18, %v1819_v28  ;;  %v1215_v23 = vadd.f32 %v1120_v51, %v971_v29  ;;  %v1967_v46 = vrot.slane %v1861_v27, 2 }
  0x76   : > { %v1968_v47 = vrot.slane %v2974_v40, 2  ;;  %v1725_v50 = vsel %vm486_vm0, %v1723_v61, %v1724_v26  ;;  %v515_v45 = vrot.slane %v407_v19, 1  ;;  %v1014_v3 = vmul.f32 %v2324_v31, %v2523_v14 }
  0x77   : > { %v760_v52 = vrot.slane %v652_v25, 2  ;;  %v2102_v7 = vadd.f32 %v2614_v43, %v2063_v38  ;;  %v1459_v39 = vadd.f32 %v1364_v37, %v1215_v23  ;;  %v940_v53 = vmul.f32 %v2875_v30, %v2521_v13 }
  0x78   : > { %v1258_v55 = vmul.f32 %v2324_v31, %v2525_v15  ;;  %v516_v36 = vsel %vm486_vm0, %v513_v54, %v515_v45  ;;  %v1121_v57 = vrot.slane %v1014_v3, 1  ;;  %v1619_v11 = vmul.f32 %v2372_v21, %v2538_v22 }
  0x79   : > { %v761_v58 = vsel %vm731_vm1, %v758_v60, %v760_v52  ;;  %2135 = vst.msk [vmem:[%s2631_s4 + $0x48] sm:$0xff] %vm2125_vm2, %v2102_v7  ;;  %v1576_v56 = vadd.f32 %v1544_v20, %v1459_v39  ;;  %v610_v35 = vadd.f32 %v516_v36, %v333_v59  ;;  %v1863_v32 = vmul.f32 %v2372_v21, %v2568_v49  ;;  %v3041_v7 = vld [vmem:[%s2511_s25 + $0xc8] sm:$0xff] }
  0x7a   : > { %v1365_v63 = vrot.slane %v1258_v55, 2  ;;  %v1969_v34 = vsel %vm731_vm1, %v1967_v46, %v1968_v47  ;;  %v1122_v42 = vsel %vm486_vm0, %v1119_v2, %v1121_v57  ;;  %v1545_v48 = vmul.f32 %v2959_v17, %v2527_v16  ;;  %v290_v57 = vld [vmem:[%s2511_s25 + $0xa0] sm:$0x3] }
  0x7b   : > { %v408_v54 = vmul.f32 %v2872_v33, %v2515_v9  ;;  %v1820_v60 = vadd.f32 %v1725_v50, %v1576_v56  ;;  %v855_v4 = vadd.f32 %v761_v58, %v610_v35  ;;  %v1726_v0 = vrot.slane %v1619_v11, 1  ;;  %v3035_v50 = vld [vmem:[%s2511_s25 + $0xc0] sm:$0xff] }
  0x7c   : > { %v334_v12 = vmul.f32 %v2872_v33, %v2513_v8  ;;  %v1366_v1 = vsel %vm731_vm1, %v1363_v62, %v1365_v63  ;;  %v3012_v44 = vmul.f32 %v2875_v30, %v2515_v9  ;;  %v653_v2 = vmul.f32 %v2872_v33, %v2517_v10 }
  0x7d   : > { %v517_v18 = vrot.slane %v408_v54, 1  ;;  %v2064_v24 = vadd.f32 %v1969_v34, %v1820_v60  ;;  %v972_v6 = vadd.f32 %v940_v53, %v855_v4  ;;  %v1970_v51 = vrot.slane %v1863_v32, 2  ;;  %v2327_v34 = vld [vmem:[%s2511_s25 + $0xb8] sm:$0x3] }
  0x7e   : > { %v654_v61 = vmul.f32 %v2875_v30, %v2517_v10  ;;  %v518_v27 = vrot.slane %v3012_v44, 1  ;;  %v762_v40 = vrot.slane %v653_v2, 2  ;;  %v941_v62 = vmul.f32 %v2953_v5, %v2521_v13  ;;  %v2375_v44 = vld [vmem:[%s2511_s25 + $0xd0] sm:$0x3] }
  0x7f   : > { %v1015_v28 = vmul.f32 %v2953_v5, %v2523_v14  ;;  %v2103_v29 = vadd.f32 %v2614_v43, %v2064_v24  ;;  %v1216_v33 = vadd.f32 %v1122_v42, %v972_v6  ;;  %v1016_v31 = vmul.f32 %v2959_v17, %v2523_v14 }
  0x80   : > { %v763_v20 = vrot.slane %v654_v61, 2  ;;  %v519_v37 = vsel %vm486_vm0, %v517_v18, %v518_v27  ;;  %v1259_v19 = vmul.f32 %v2953_v5, %v2525_v15  ;;  %v1260_v25 = vmul.f32 %v2959_v17, %v2525_v15 }
  0x81   : > { %v1123_v59 = vrot.slane %v1015_v28, 1  ;;  %2136 = vst.msk [vmem:[%s2631_s4 + $0x50] sm:$0xff] %vm2125_vm2, %v2103_v29  ;;  %v1460_v38 = vadd.f32 %v1366_v1, %v1216_v33  ;;  %v611_v23 = vadd.f32 %v519_v37, %v334_v12  ;;  %v1124_v21 = vrot.slane %v1016_v31, 1 }
  0x82   : > { %v764_v46 = vsel %vm731_vm1, %v762_v40, %v763_v20  ;;  %v1727_v45 = vsel %vm486_vm0, %v1724_v26, %v1726_v0  ;;  %v1367_v52 = vrot.slane %v1259_v19, 2  ;;  %v1368_v3 = vrot.slane %v1260_v25, 2 }
  0x83   : > { %v1620_v39 = vmul.f32 %v3035_v50, %v2538_v22  ;;  %v1577_v53 = vadd.f32 %v1545_v48, %v1460_v38  ;;  %v1971_v55 = vsel %vm731_vm1, %v1968_v47, %v1970_v51  ;;  %v856_v36 = vadd.f32 %v764_v46, %v611_v23 }
  0x84   : > { %v3048_v58 = vmul.f32 %v3041_v7, %v2538_v22  ;;  %v1125_v41 = vsel %vm486_vm0, %v1123_v59, %v1124_v21  ;;  %v1864_v11 = vmul.f32 %v3035_v50, %v2568_v49  ;;  %v3056_v56 = vmul.f32 %v3041_v7, %v2568_v49 }
  0x85   : > { %v1728_v26 = vrot.slane %v1620_v39, 1  ;;  %v1821_v35 = vadd.f32 %v1727_v45, %v1577_v53  ;;  %v973_v63 = vadd.f32 %v941_v62, %v856_v36  ;;  %v1546_v47 = vmul.f32 %v3035_v50, %v2527_v16 }
  0x86   : > { %v1729_v32 = vrot.slane %v3048_v58, 1  ;;  %v1369_v42 = vsel %vm731_vm1, %v1367_v52, %v1368_v3  ;;  %v335_v48 = vmul.f32 %v2875_v30, %v2513_v8  ;;  %v410_v54 = vmul.f32 %v2515_v9, %v290_v57  ;;  %v293_v58 = vld [vmem:[%s2511_s25 + $0xb8] sm:$0x3] }
  0x87   : > { %v655_v60 = vmul.f32 %v2517_v10, %v290_v57  ;;  %v2065_v4 = vadd.f32 %v1971_v55, %v1821_v35  ;;  %v1217_v0 = vadd.f32 %v1125_v41, %v973_v63  ;;  %v1972_v12 = vrot.slane %v1864_v11, 2 }
  0x88   : > { %v1973_v1 = vrot.slane %v3056_v56, 2  ;;  %v1730_v18 = vsel %vm486_vm0, %v1728_v26, %v1729_v32  ;;  %v520_v2 = vrot.slane %v410_v54, 1  ;;  %v1017_v6 = vmul.f32 %v2327_v34, %v2523_v14 }
  0x89   : > { %v765_v24 = vrot.slane %v655_v60, 2  ;;  %v2104_v30 = vadd.f32 %v2614_v43, %v2065_v4  ;;  %v1461_v51 = vadd.f32 %v1369_v42, %v1217_v0  ;;  %v942_v61 = vmul.f32 %v2959_v17, %v2521_v13 }
  0x8a   : > { %v1261_v40 = vmul.f32 %v2327_v34, %v2525_v15  ;;  %v521_v62 = vsel %vm486_vm0, %v518_v27, %v520_v2  ;;  %v1126_v29 = vrot.slane %v1017_v6, 1  ;;  %v1622_v33 = vmul.f32 %v2375_v44, %v2538_v22  ;;  %v3126_v6 = vld [vmem:[%s2511_s25 + $0xe0] sm:$0xff] }
  0x8b   : > { %v766_v28 = vsel %vm731_vm1, %v763_v20, %v765_v24  ;;  %2137 = vst.msk [vmem:[%s2631_s4 + $0x58] sm:$0xff] %vm2125_vm2, %v2104_v30  ;;  %v1578_v31 = vadd.f32 %v1546_v47, %v1461_v51  ;;  %v612_v37 = vadd.f32 %v521_v62, %v335_v48  ;;  %v1866_v19 = vmul.f32 %v2375_v44, %v2568_v49  ;;  %v3119_v44 = vld [vmem:[%s2511_s25 + $0xd8] sm:$0xff] }
  0x8c   : > { %v1370_v59 = vrot.slane %v1261_v40, 2  ;;  %v1974_v25 = vsel %vm731_vm1, %v1972_v12, %v1973_v1  ;;  %v1127_v38 = vsel %vm486_vm0, %v1124_v21, %v1126_v29  ;;  %v1547_v23 = vmul.f32 %v3041_v7, %v2527_v16 }
  0x8d   : > { %v411_v27 = vmul.f32 %v2953_v5, %v2515_v9  ;;  %v1822_v20 = vadd.f32 %v1730_v18, %v1578_v31  ;;  %v857_v46 = vadd.f32 %v766_v28, %v612_v37  ;;  %v1731_v45 = vrot.slane %v1622_v33, 1 }
  0x8e   : > { %v336_v52 = vmul.f32 %v2953_v5, %v2513_v8  ;;  %v1371_v39 = vsel %vm731_vm1, %v1368_v3, %v1370_v59  ;;  %v3094_v53 = vmul.f32 %v2959_v17, %v2515_v9  ;;  %v656_v21 = vmul.f32 %v2953_v5, %v2517_v10 }
  0x8f   : > { %v522_v55 = vrot.slane %v411_v27, 1  ;;  %v2066_v36 = vadd.f32 %v1974_v25, %v1822_v20  ;;  %v974_v57 = vadd.f32 %v942_v61, %v857_v46  ;;  %v1975_v41 = vrot.slane %v1866_v19, 2  ;;  %v2330_v19 = vld [vmem:[%s2511_s25 + $0xd0] sm:$0x3] }
  0x90   : > { %v657_v26 = vmul.f32 %v2959_v17, %v2517_v10  ;;  %v523_v11 = vrot.slane %v3094_v53, 1  ;;  %v767_v56 = vrot.slane %v656_v21, 2  ;;  %v943_v3 = vmul.f32 %v3035_v50, %v2521_v13 }
  0x91   : > { %v1018_v35 = vmul.f32 %v3035_v50, %v2523_v14  ;;  %v2105_v63 = vadd.f32 %v2614_v43, %v2066_v36  ;;  %v1218_v5 = vadd.f32 %v1127_v38, %v974_v57  ;;  %v1019_v34 = vmul.f32 %v3041_v7, %v2523_v14 }
  0x92   : > { %v768_v47 = vrot.slane %v657_v26, 2  ;;  %v524_v42 = vsel %vm486_vm0, %v522_v55, %v523_v11  ;;  %v1262_v54 = vmul.f32 %v3035_v50, %v2525_v15  ;;  %v3113_v60 = vmul.f32 %v3041_v7, %v2525_v15 }
  0x93   : > { %v1128_v48 = vrot.slane %v1018_v35, 1  ;;  %2138 = vst.msk [vmem:[%s2631_s4 + $0x60] sm:$0xff] %vm2125_vm2, %v2105_v63  ;;  %v1462_v43 = vadd.f32 %v1371_v39, %v1218_v5  ;;  %v613_v4 = vadd.f32 %v524_v42, %v336_v52  ;;  %v1129_v12 = vrot.slane %v1019_v34, 1  ;;  %v2378_v39 = vld [vmem:[%s2511_s25 + $0xe8] sm:$0x3] }
  0x94   : > { %v769_v0 = vsel %vm731_vm1, %v767_v56, %v768_v47  ;;  %v1732_v18 = vsel %vm486_vm0, %v1729_v32, %v1731_v45  ;;  %v1372_v2 = vrot.slane %v1262_v54, 2  ;;  %v1373_v24 = vrot.slane %v3113_v60, 2 }
  0x95   : > { %v1623_v30 = vmul.f32 %v3119_v44, %v2538_v22  ;;  %v1579_v51 = vadd.f32 %v1547_v23, %v1462_v43  ;;  %v1976_v61 = vsel %vm731_vm1, %v1973_v1, %v1975_v41  ;;  %v858_v40 = vadd.f32 %v769_v0, %v613_v4 }
  0x96   : > { %v3133_v62 = vmul.f32 %v3126_v6, %v2538_v22  ;;  %v1130_v32 = vsel %vm486_vm0, %v1128_v48, %v1129_v12  ;;  %v1867_v29 = vmul.f32 %v3119_v44, %v2568_v49  ;;  %v3141_v33 = vmul.f32 %v3126_v6, %v2568_v49 }
  0x97   : > { %v1733_v28 = vrot.slane %v1623_v30, 1  ;;  %v1823_v31 = vadd.f32 %v1732_v18, %v1579_v51  ;;  %v975_v37 = vadd.f32 %v943_v3, %v858_v40  ;;  %v1548_v1 = vmul.f32 %v3119_v44, %v2527_v16 }
  0x98   : > { %v1734_v59 = vrot.slane %v3133_v62, 1  ;;  %v1374_v25 = vsel %vm731_vm1, %v1372_v2, %v1373_v24  ;;  %v337_v38 = vmul.f32 %v2959_v17, %v2513_v8  ;;  %v413_v23 = vmul.f32 %v2515_v9, %v293_v58  ;;  %v3161_v17 = vld [vmem:[%s3844_s2] ss:$0 sm:$0xff] }
  0x99   : > { %v658_v27 = vmul.f32 %v2517_v10, %v293_v58  ;;  %v2067_v20 = vadd.f32 %v1976_v61, %v1823_v31  ;;  %v1219_v46 = vadd.f32 %v1130_v32, %v975_v37  ;;  %v1977_v45 = vrot.slane %v1867_v29, 2 }
  0x9a   : > { %v1978_v52 = vrot.slane %v3141_v33, 2  ;;  %v1735_v53 = vsel %vm486_vm0, %v1733_v28, %v1734_v59  ;;  %v525_v55 = vrot.slane %v413_v23, 1  ;;  %v1020_v36 = vmul.f32 %v2330_v19, %v2523_v14 }
  0x9b   : > { %v770_v21 = vrot.slane %v658_v27, 2  ;;  %v2106_v57 = vadd.f32 %v3161_v17, %v2067_v20  ;;  %v1463_v41 = vadd.f32 %v1374_v25, %v1219_v46  ;;  %v944_v26 = vmul.f32 %v3041_v7, %v2521_v13 }
  0x9c   : > { %v1264_v56 = vmul.f32 %v2330_v19, %v2525_v15  ;;  %v526_v3 = vsel %vm486_vm0, %v523_v11, %v525_v55  ;;  %v1131_v63 = vrot.slane %v1020_v36, 1  ;;  %v1625_v5 = vmul.f32 %v2378_v39, %v2538_v22 }
  0x9d   : > { %v771_v35 = vsel %vm731_vm1, %v768_v47, %v770_v21  ;;  %2139 = vst.msk [vmem:[%s2631_s4 + $0x68] sm:$0xff] %vm2125_vm2, %v2106_v57  ;;  %v1580_v34 = vadd.f32 %v1548_v1, %v1463_v41  ;;  %v614_v42 = vadd.f32 %v526_v3, %v337_v38  ;;  %v1869_v54 = vmul.f32 %v2378_v39, %v2568_v49  ;;  %v3213_v57 = vld [vmem:[%s2511_s25 + $0xf8] sm:$0xff] }
  0x9e   : > { %v1375_v48 = vrot.slane %v1264_v56, 2  ;;  %v1979_v60 = vsel %vm731_vm1, %v1977_v45, %v1978_v52  ;;  %v1132_v43 = vsel %vm486_vm0, %v1129_v12, %v1131_v63  ;;  %v1549_v4 = vmul.f32 %v3126_v6, %v2527_v16  ;;  %v296_v63 = vld [vmem:[%s2511_s25 + $0xd0] sm:$0x3] }
  0x9f   : > { %v414_v11 = vmul.f32 %v3035_v50, %v2515_v9  ;;  %v1824_v47 = vadd.f32 %v1735_v53, %v1580_v34  ;;  %v859_v0 = vadd.f32 %v771_v35, %v614_v42  ;;  %v1736_v18 = vrot.slane %v1625_v5, 1  ;;  %v3207_v53 = vld [vmem:[%s2511_s25 + $0xf0] sm:$0xff] }
  0xa0   : > { %v338_v2 = vmul.f32 %v3035_v50, %v2513_v8  ;;  %v1376_v30 = vsel %vm731_vm1, %v1373_v24, %v1375_v48  ;;  %v3184_v51 = vmul.f32 %v3041_v7, %v2515_v9  ;;  %v659_v12 = vmul.f32 %v3035_v50, %v2517_v10 }
  0xa1   : > { %v527_v61 = vrot.slane %v414_v11, 1  ;;  %v2068_v40 = vadd.f32 %v1979_v60, %v1824_v47  ;;  %v976_v58 = vadd.f32 %v944_v26, %v859_v0  ;;  %v1980_v32 = vrot.slane %v1869_v54, 2  ;;  %v2333_v60 = vld [vmem:[%s2511_s25 + $0xe8] sm:$0x3] }
  0xa2   : > { %v660_v28 = vmul.f32 %v3041_v7, %v2517_v10  ;;  %v528_v29 = vrot.slane %v3184_v51, 1  ;;  %v772_v33 = vrot.slane %v659_v12, 2  ;;  %v945_v24 = vmul.f32 %v3119_v44, %v2521_v13  ;;  %v2381_v51 = vld [vmem:[%s2511_s25 + $0x100] sm:$0x3] }
  0xa3   : > { %v1021_v31 = vmul.f32 %v3119_v44, %v2523_v14  ;;  %v2107_v37 = vadd.f32 %v3161_v17, %v2068_v40  ;;  %v1220_v50 = vadd.f32 %v1132_v43, %v976_v58  ;;  %v1022_v19 = vmul.f32 %v3126_v6, %v2523_v14 }
  0xa4   : > { %v773_v1 = vrot.slane %v660_v28, 2  ;;  %v529_v25 = vsel %vm486_vm0, %v527_v61, %v528_v29  ;;  %v1265_v23 = vmul.f32 %v3119_v44, %v2525_v15  ;;  %v1266_v27 = vmul.f32 %v3126_v6, %v2525_v15 }
  0xa5   : > { %v1133_v38 = vrot.slane %v1021_v31, 1  ;;  %2140 = vst.msk [vmem:[%s2631_s4 + $0x70] sm:$0xff] %vm2125_vm2, %v2107_v37  ;;  %v1464_v20 = vadd.f32 %v1376_v30, %v1220_v50  ;;  %v615_v46 = vadd.f32 %v529_v25, %v338_v2  ;;  %v1134_v39 = vrot.slane %v1022_v19, 1 }
  0xa6   : > { %v774_v45 = vsel %vm731_vm1, %v772_v33, %v773_v1  ;;  %v1737_v55 = vsel %vm486_vm0, %v1734_v59, %v1736_v18  ;;  %v1377_v21 = vrot.slane %v1265_v23, 2  ;;  %v1378_v36 = vrot.slane %v1266_v27, 2 }
  0xa7   : > { %v1626_v41 = vmul.f32 %v3207_v53, %v2538_v22  ;;  %v1581_v26 = vadd.f32 %v1549_v4, %v1464_v20  ;;  %v1981_v56 = vsel %vm731_vm1, %v1978_v52, %v1980_v32  ;;  %v860_v3 = vadd.f32 %v774_v45, %v615_v46 }
  0xa8   : > { %v3220_v35 = vmul.f32 %v3213_v57, %v2538_v22  ;;  %v1135_v62 = vsel %vm486_vm0, %v1133_v38, %v1134_v39  ;;  %v1870_v5 = vmul.f32 %v3207_v53, %v2568_v49  ;;  %v3228_v34 = vmul.f32 %v3213_v57, %v2568_v49 }
  0xa9   : > { %v1738_v59 = vrot.slane %v1626_v41, 1  ;;  %v1825_v42 = vadd.f32 %v1737_v55, %v1581_v26  ;;  %v977_v48 = vadd.f32 %v945_v24, %v860_v3  ;;  %v1550_v52 = vmul.f32 %v3207_v53, %v2527_v16 }
  0xaa   : > { %v1739_v54 = vrot.slane %v3220_v35, 1  ;;  %v1379_v43 = vsel %vm731_vm1, %v1377_v21, %v1378_v36  ;;  %v339_v4 = vmul.f32 %v3041_v7, %v2513_v8  ;;  %v416_v11 = vmul.f32 %v2515_v9, %v296_v63 }
  0xab   : > { %v661_v47 = vmul.f32 %v2517_v10, %v296_v63  ;;  %v2069_v0 = vadd.f32 %v1981_v56, %v1825_v42  ;;  %v1221_v18 = vadd.f32 %v1135_v62, %v977_v48  ;;  %v1982_v2 = vrot.slane %v1870_v5, 2 }
  0xac   : > { %v1983_v30 = vrot.slane %v3228_v34, 2  ;;  %v1740_v61 = vsel %vm486_vm0, %v1738_v59, %v1739_v54  ;;  %v530_v12 = vrot.slane %v416_v11, 1  ;;  %v1023_v58 = vmul.f32 %v2333_v60, %v2523_v14 }
  0xad   : > { %v775_v40 = vrot.slane %v661_v47, 2  ;;  %v2108_v7 = vadd.f32 %v3161_v17, %v2069_v0  ;;  %v1465_v32 = vadd.f32 %v1379_v43, %v1221_v18  ;;  %v946_v28 = vmul.f32 %v3126_v6, %v2521_v13 }
  0xae   : > { %v1267_v33 = vmul.f32 %v2333_v60, %v2525_v15  ;;  %v531_v24 = vsel %vm486_vm0, %v528_v29, %v530_v12  ;;  %v1136_v37 = vrot.slane %v1023_v58, 1  ;;  %v1628_v50 = vmul.f32 %v2381_v51, %v2538_v22 }
  0xaf   : > { %v776_v31 = vsel %vm731_vm1, %v773_v1, %v775_v40  ;;  %2141 = vst.msk [vmem:[%s2631_s4 + $0x78] sm:$0xff] %vm2125_vm2, %v2108_v7  ;;  %v1582_v19 = vadd.f32 %v1550_v52, %v1465_v32  ;;  %v616_v25 = vadd.f32 %v531_v24, %v339_v4  ;;  %v1872_v23 = vmul.f32 %v2381_v51, %v2568_v49  ;;  %v3295_v7 = vld [vmem:[%s2511_s25 + $0x110] sm:$0xff] }
  0xb0   : > { %v1380_v38 = vrot.slane %v1267_v33, 2  ;;  %v1984_v27 = vsel %vm731_vm1, %v1982_v2, %v1983_v30  ;;  %v1137_v20 = vsel %vm486_vm0, %v1134_v39, %v1136_v37  ;;  %v1551_v46 = vmul.f32 %v3213_v57, %v2527_v16  ;;  %v299_v37 = vld [vmem:[%s2511_s25 + $0xe8] sm:$0x3] }
  0xb1   : > { %v417_v29 = vmul.f32 %v3119_v44, %v2515_v9  ;;  %v1826_v1 = vadd.f32 %v1740_v61, %v1582_v19  ;;  %v861_v45 = vadd.f32 %v776_v31, %v616_v25  ;;  %v1741_v55 = vrot.slane %v1628_v50, 1  ;;  %v3289_v61 = vld [vmem:[%s2511_s25 + $0x108] sm:$0xff] }
  0xb2   : > { %v340_v21 = vmul.f32 %v3119_v44, %v2513_v8  ;;  %v1381_v41 = vsel %vm731_vm1, %v1378_v36, %v1380_v38  ;;  %v3266_v26 = vmul.f32 %v3126_v6, %v2515_v9  ;;  %v662_v39 = vmul.f32 %v3119_v44, %v2517_v10 }
  0xb3   : > { %v532_v56 = vrot.slane %v417_v29, 1  ;;  %v2070_v3 = vadd.f32 %v1984_v27, %v1826_v1  ;;  %v978_v63 = vadd.f32 %v946_v28, %v861_v45  ;;  %v1985_v62 = vrot.slane %v1872_v23, 2  ;;  %v2336_v27 = vld [vmem:[%s2511_s25 + $0x100] sm:$0x3] }
  0xb4   : > { %v663_v59 = vmul.f32 %v3126_v6, %v2517_v10  ;;  %v533_v5 = vrot.slane %v3266_v26, 1  ;;  %v777_v34 = vrot.slane %v662_v39, 2  ;;  %v947_v36 = vmul.f32 %v3207_v53, %v2521_v13  ;;  %v2384_v26 = vld [vmem:[%s2511_s25 + $0x118] sm:$0x3] }
  0xb5   : > { %v1024_v42 = vmul.f32 %v3207_v53, %v2523_v14  ;;  %v2109_v48 = vadd.f32 %v3161_v17, %v2070_v3  ;;  %v1222_v44 = vadd.f32 %v1137_v20, %v978_v63  ;;  %v1025_v60 = vmul.f32 %v3213_v57, %v2523_v14 }
  0xb6   : > { %v778_v52 = vrot.slane %v663_v59, 2  ;;  %v534_v43 = vsel %vm486_vm0, %v532_v56, %v533_v5  ;;  %v1268_v11 = vmul.f32 %v3207_v53, %v2525_v15  ;;  %v1269_v47 = vmul.f32 %v3213_v57, %v2525_v15 }
  0xb7   : > { %v1138_v4 = vrot.slane %v1024_v42, 1  ;;  %2142 = vst.msk [vmem:[%s2631_s4 + $0x80] sm:$0xff] %vm2125_vm2, %v2109_v48  ;;  %v1466_v0 = vadd.f32 %v1381_v41, %v1222_v44  ;;  %v617_v18 = vadd.f32 %v534_v43, %v340_v21  ;;  %v1139_v51 = vrot.slane %v1025_v60, 1 }
  0xb8   : > { %v779_v2 = vsel %vm731_vm1, %v777_v34, %v778_v52  ;;  %v1742_v12 = vsel %vm486_vm0, %v1739_v54, %v1741_v55  ;;  %v1382_v40 = vrot.slane %v1268_v11, 2  ;;  %v1383_v58 = vrot.slane %v1269_v47, 2 }
  0xb9   : > { %v1629_v32 = vmul.f32 %v3289_v61, %v2538_v22  ;;  %v1583_v28 = vadd.f32 %v1551_v46, %v1466_v0  ;;  %v1986_v33 = vsel %vm731_vm1, %v1983_v30, %v1985_v62  ;;  %v862_v24 = vadd.f32 %v779_v2, %v617_v18 }
  0xba   : > { %v3302_v31 = vmul.f32 %v3295_v7, %v2538_v22  ;;  %v1140_v35 = vsel %vm486_vm0, %v1138_v4, %v1139_v51  ;;  %v1873_v50 = vmul.f32 %v3289_v61, %v2568_v49  ;;  %v3310_v19 = vmul.f32 %v3295_v7, %v2568_v49 }
  0xbb   : > { %v1743_v54 = vrot.slane %v1629_v32, 1  ;;  %v1827_v25 = vadd.f32 %v1742_v12, %v1583_v28  ;;  %v979_v38 = vadd.f32 %v947_v36, %v862_v24  ;;  %v1552_v30 = vmul.f32 %v3289_v61, %v2527_v16 }
  0xbc   : > { %v1744_v23 = vrot.slane %v3302_v31, 1  ;;  %v1384_v20 = vsel %vm731_vm1, %v1382_v40, %v1383_v58  ;;  %v341_v46 = vmul.f32 %v3126_v6, %v2513_v8  ;;  %v419_v29 = vmul.f32 %v2515_v9, %v299_v37 }
  0xbd   : > { %v664_v1 = vmul.f32 %v2517_v10, %v299_v37  ;;  %v2071_v45 = vadd.f32 %v1986_v33, %v1827_v25  ;;  %v1223_v55 = vadd.f32 %v1140_v35, %v979_v38  ;;  %v1987_v21 = vrot.slane %v1873_v50, 2 }
  0xbe   : > { %v1988_v41 = vrot.slane %v3310_v19, 2  ;;  %v1745_v56 = vsel %vm486_vm0, %v1743_v54, %v1744_v23  ;;  %v535_v39 = vrot.slane %v419_v29, 1  ;;  %v1026_v63 = vmul.f32 %v2336_v27, %v2523_v14 }
  0xbf   : > { %v780_v3 = vrot.slane %v664_v1, 2  ;;  %v2110_v6 = vadd.f32 %v3161_v17, %v2071_v45  ;;  %v1467_v62 = vadd.f32 %v1384_v20, %v1223_v55  ;;  %v948_v59 = vmul.f32 %v3213_v57, %v2521_v13 }
  0xc0   : > { %v1270_v34 = vmul.f32 %v2336_v27, %v2525_v15  ;;  %v536_v36 = vsel %vm486_vm0, %v533_v5, %v535_v39  ;;  %v1141_v48 = vrot.slane %v1026_v63, 1  ;;  %v1631_v44 = vmul.f32 %v2384_v26, %v2538_v22 }
  0xc1   : > { %v781_v42 = vsel %vm731_vm1, %v778_v52, %v780_v3  ;;  %2143 = vst.msk [vmem:[%s2631_s4 + $0x88] sm:$0xff] %vm2125_vm2, %v2110_v6  ;;  %v1584_v60 = vadd.f32 %v1552_v30, %v1467_v62  ;;  %v618_v43 = vadd.f32 %v536_v36, %v341_v46  ;;  %v1875_v11 = vmul.f32 %v2384_v26, %v2568_v49  ;;  %v3377_v6 = vld [vmem:[%s2511_s25 + $0x128] sm:$0xff] }
  0xc2   : > { %v1385_v4 = vrot.slane %v1270_v34, 2  ;;  %v1989_v47 = vsel %vm731_vm1, %v1987_v21, %v1988_v41  ;;  %v1142_v0 = vsel %vm486_vm0, %v1139_v51, %v1141_v48  ;;  %v1553_v18 = vmul.f32 %v3295_v7, %v2527_v16  ;;  %v302_v48 = vld [vmem:[%s2511_s25 + $0x100] sm:$0x3] }
  0xc3   : > { %v420_v5 = vmul.f32 %v3207_v53, %v2515_v9  ;;  %v1828_v52 = vadd.f32 %v1745_v56, %v1584_v60  ;;  %v863_v2 = vadd.f32 %v781_v42, %v618_v43  ;;  %v1746_v12 = vrot.slane %v1631_v44, 1  ;;  %v3371_v56 = vld [vmem:[%s2511_s25 + $0x120] sm:$0xff] }
  0xc4   : > { %v342_v40 = vmul.f32 %v3207_v53, %v2513_v8  ;;  %v1386_v32 = vsel %vm731_vm1, %v1383_v58, %v1385_v4  ;;  %v3348_v28 = vmul.f32 %v3213_v57, %v2515_v9  ;;  %v665_v51 = vmul.f32 %v3207_v53, %v2517_v10 }
  0xc5   : > { %v537_v33 = vrot.slane %v420_v5, 1  ;;  %v2072_v24 = vadd.f32 %v1989_v47, %v1828_v52  ;;  %v980_v37 = vadd.f32 %v948_v59, %v863_v2  ;;  %v1990_v35 = vrot.slane %v1875_v11, 2  ;;  %v2339_v47 = vld [vmem:[%s2511_s25 + $0x118] sm:$0x3] }
  0xc6   : > { %v666_v54 = vmul.f32 %v3213_v57, %v2517_v10  ;;  %v538_v50 = vrot.slane %v3348_v28, 1  ;;  %v782_v19 = vrot.slane %v665_v51, 2  ;;  %v949_v58 = vmul.f32 %v3289_v61, %v2521_v13  ;;  %v2387_v28 = vld [vmem:[%s2511_s25 + $0x130] sm:$0x3] }
  0xc7   : > { %v1027_v25 = vmul.f32 %v3289_v61, %v2523_v14  ;;  %v2111_v38 = vadd.f32 %v3161_v17, %v2072_v24  ;;  %v1224_v53 = vadd.f32 %v1142_v0, %v980_v37  ;;  %v1028_v27 = vmul.f32 %v3295_v7, %v2523_v14 }
  0xc8   : > { %v783_v30 = vrot.slane %v666_v54, 2  ;;  %v539_v20 = vsel %vm486_vm0, %v537_v33, %v538_v50  ;;  %v1271_v29 = vmul.f32 %v3289_v61, %v2525_v15  ;;  %v1272_v1 = vmul.f32 %v3295_v7, %v2525_v15 }
  0xc9   : > { %v1143_v46 = vrot.slane %v1027_v25, 1  ;;  %2144 = vst.msk [vmem:[%s2631_s4 + $0x90] sm:$0xff] %vm2125_vm2, %v2111_v38  ;;  %v1468_v45 = vadd.f32 %v1386_v32, %v1224_v53  ;;  %v619_v55 = vadd.f32 %v539_v20, %v342_v40  ;;  %v1144_v26 = vrot.slane %v1028_v27, 1 }
  0xca   : > { %v784_v21 = vsel %vm731_vm1, %v782_v19, %v783_v30  ;;  %v1747_v39 = vsel %vm486_vm0, %v1744_v23, %v1746_v12  ;;  %v1387_v3 = vrot.slane %v1271_v29, 2  ;;  %v1388_v63 = vrot.slane %v1272_v1, 2 }
  0xcb   : > { %v1632_v62 = vmul.f32 %v3371_v56, %v2538_v22  ;;  %v1585_v59 = vadd.f32 %v1553_v18, %v1468_v45  ;;  %v1991_v34 = vsel %vm731_vm1, %v1988_v41, %v1990_v35  ;;  %v864_v36 = vadd.f32 %v784_v21, %v619_v55 }
  0xcc   : > { %v3384_v42 = vmul.f32 %v3377_v6, %v2538_v22  ;;  %v1145_v31 = vsel %vm486_vm0, %v1143_v46, %v1144_v26  ;;  %v1876_v44 = vmul.f32 %v3371_v56, %v2568_v49  ;;  %v3392_v60 = vmul.f32 %v3377_v6, %v2568_v49 }
  0xcd   : > { %v1748_v23 = vrot.slane %v1632_v62, 1  ;;  %v1829_v43 = vadd.f32 %v1747_v39, %v1585_v59  ;;  %v981_v4 = vadd.f32 %v949_v58, %v864_v36  ;;  %v1554_v41 = vmul.f32 %v3371_v56, %v2527_v16 }
  0xce   : > { %v1749_v11 = vrot.slane %v3384_v42, 1  ;;  %v1389_v0 = vsel %vm731_vm1, %v1387_v3, %v1388_v63  ;;  %v343_v18 = vmul.f32 %v3213_v57, %v2513_v8  ;;  %v422_v5 = vmul.f32 %v2515_v9, %v302_v48 }
  0xcf   : > { %v667_v52 = vmul.f32 %v2517_v10, %v302_v48  ;;  %v2073_v2 = vadd.f32 %v1991_v34, %v1829_v43  ;;  %v1225_v12 = vadd.f32 %v1145_v31, %v981_v4  ;;  %v1992_v40 = vrot.slane %v1876_v44, 2 }
  0xd0   : > { %v1993_v32 = vrot.slane %v3392_v60, 2  ;;  %v1750_v33 = vsel %vm486_vm0, %v1748_v23, %v1749_v11  ;;  %v540_v51 = vrot.slane %v422_v5, 1  ;;  %v1029_v37 = vmul.f32 %v2339_v47, %v2523_v14 }
  0xd1   : > { %v785_v24 = vrot.slane %v667_v52, 2  ;;  %v2112_v57 = vadd.f32 %v3161_v17, %v2073_v2  ;;  %v1469_v35 = vadd.f32 %v1389_v0, %v1225_v12  ;;  %v950_v54 = vmul.f32 %v3295_v7, %v2521_v13 }
  0xd2   : > { %v1273_v19 = vmul.f32 %v2339_v47, %v2525_v15  ;;  %v541_v58 = vsel %vm486_vm0, %v538_v50, %v540_v51  ;;  %v1146_v38 = vrot.slane %v1029_v37, 1  ;;  %v1634_v53 = vmul.f32 %v2387_v28, %v2538_v22 }
  0xd3   : > { %v786_v25 = vsel %vm731_vm1, %v783_v30, %v785_v24  ;;  %2145 = vst.msk [vmem:[%s2631_s4 + $0x98] sm:$0xff] %vm2125_vm2, %v2112_v57  ;;  %v1586_v27 = vadd.f32 %v1554_v41, %v1469_v35  ;;  %v620_v20 = vadd.f32 %v541_v58, %v343_v18  ;;  %v1878_v29 = vmul.f32 %v2387_v28, %v2568_v49  ;;  %v3459_v57 = vld [vmem:[%s2511_s25 + $0x140] sm:$0xff] }
  0xd4   : > { %v1390_v46 = vrot.slane %v1273_v19, 2  ;;  %v1994_v1 = vsel %vm731_vm1, %v1992_v40, %v1993_v32  ;;  %v1147_v45 = vsel %vm486_vm0, %v1144_v26, %v1146_v38  ;;  %v1555_v55 = vmul.f32 %v3377_v6, %v2527_v16  ;;  %v305_v38 = vld [vmem:[%s2511_s25 + $0x118] sm:$0x3] }
  0xd5   : > { %v423_v50 = vmul.f32 %v3289_v61, %v2515_v9  ;;  %v1830_v30 = vadd.f32 %v1750_v33, %v1586_v27  ;;  %v865_v21 = vadd.f32 %v786_v25, %v620_v20  ;;  %v1751_v39 = vrot.slane %v1634_v53, 1  ;;  %v3453_v33 = vld [vmem:[%s2511_s25 + $0x138] sm:$0xff] }
  0xd6   : > { %v344_v3 = vmul.f32 %v3289_v61, %v2513_v8  ;;  %v1391_v62 = vsel %vm731_vm1, %v1388_v63, %v1390_v46  ;;  %v3430_v59 = vmul.f32 %v3295_v7, %v2515_v9  ;;  %v668_v26 = vmul.f32 %v3289_v61, %v2517_v10 }
  0xd7   : > { %v542_v34 = vrot.slane %v423_v50, 1  ;;  %v2074_v36 = vadd.f32 %v1994_v1, %v1830_v30  ;;  %v982_v48 = vadd.f32 %v950_v54, %v865_v21  ;;  %v1995_v31 = vrot.slane %v1878_v29, 2  ;;  %v2342_v1 = vld [vmem:[%s2511_s25 + $0x130] sm:$0x3] }
  0xd8   : > { %v669_v23 = vmul.f32 %v3295_v7, %v2517_v10  ;;  %v543_v44 = vrot.slane %v3430_v59, 1  ;;  %v787_v60 = vrot.slane %v668_v26, 2  ;;  %v951_v63 = vmul.f32 %v3371_v56, %v2521_v13  ;;  %v2390_v59 = vld [vmem:[%s2511_s25 + $0x148] sm:$0x3] }
  0xd9   : > { %v1030_v43 = vmul.f32 %v3371_v56, %v2523_v14  ;;  %v2113_v4 = vadd.f32 %v3161_v17, %v2074_v36  ;;  %v1226_v61 = vadd.f32 %v1147_v45, %v982_v48  ;;  %v1031_v47 = vmul.f32 %v3377_v6, %v2523_v14 }
  0xda   : > { %v788_v41 = vrot.slane %v669_v23, 2  ;;  %v544_v0 = vsel %vm486_vm0, %v542_v34, %v543_v44  ;;  %v1274_v5 = vmul.f32 %v3371_v56, %v2525_v15  ;;  %v1275_v52 = vmul.f32 %v3377_v6, %v2525_v15 }
  0xdb   : > { %v1148_v18 = vrot.slane %v1030_v43, 1  ;;  %2146 = vst.msk [vmem:[%s2631_s4 + $0xa0] sm:$0xff] %vm2125_vm2, %v2113_v4  ;;  %v1470_v2 = vadd.f32 %v1391_v62, %v1226_v61  ;;  %v621_v12 = vadd.f32 %v544_v0, %v344_v3  ;;  %v1149_v28 = vrot.slane %v1031_v47, 1 }
  0xdc   : > { %v789_v40 = vsel %vm731_vm1, %v787_v60, %v788_v41  ;;  %v1752_v51 = vsel %vm486_vm0, %v1749_v11, %v1751_v39  ;;  %v1392_v24 = vrot.slane %v1274_v5, 2  ;;  %v1393_v37 = vrot.slane %v1275_v52, 2 }
  0xdd   : > { %v1635_v35 = vmul.f32 %v3453_v33, %v2538_v22  ;;  %v1587_v54 = vadd.f32 %v1555_v55, %v1470_v2  ;;  %v1996_v19 = vsel %vm731_vm1, %v1993_v32, %v1995_v31  ;;  %v866_v58 = vadd.f32 %v789_v40, %v621_v12 }
  0xde   : > { %v3466_v25 = vmul.f32 %v3459_v57, %v2538_v22  ;;  %v1150_v42 = vsel %vm486_vm0, %v1148_v18, %v1149_v28  ;;  %v1879_v53 = vmul.f32 %v3453_v33, %v2568_v49  ;;  %v3474_v27 = vmul.f32 %v3459_v57, %v2568_v49 }
  0xdf   : > { %v1753_v11 = vrot.slane %v1635_v35, 1  ;;  %v1831_v20 = vadd.f32 %v1752_v51, %v1587_v54  ;;  %v983_v46 = vadd.f32 %v951_v63, %v866_v58  ;;  %v1556_v32 = vmul.f32 %v3453_v33, %v2527_v16 }
  0xe0   : > { %v1754_v29 = vrot.slane %v3466_v25, 1  ;;  %v1394_v45 = vsel %vm731_vm1, %v1392_v24, %v1393_v37  ;;  %v345_v55 = vmul.f32 %v3295_v7, %v2513_v8  ;;  %v425_v50 = vmul.f32 %v2515_v9, %v305_v38 }
  0xe1   : > { %v670_v30 = vmul.f32 %v2517_v10, %v305_v38  ;;  %v2075_v21 = vadd.f32 %v1996_v19, %v1831_v20  ;;  %v1227_v39 = vadd.f32 %v1150_v42, %v983_v46  ;;  %v1997_v3 = vrot.slane %v1879_v53, 2 }
  0xe2   : > { %v1998_v62 = vrot.slane %v3474_v27, 2  ;;  %v1755_v34 = vsel %vm486_vm0, %v1753_v11, %v1754_v29  ;;  %v545_v26 = vrot.slane %v425_v50, 1  ;;  %v1032_v48 = vmul.f32 %v2342_v1, %v2523_v14 }
  0xe3   : > { %v790_v36 = vrot.slane %v670_v30, 2  ;;  %v2114_v7 = vadd.f32 %v3161_v17, %v2075_v21  ;;  %v1471_v31 = vadd.f32 %v1394_v45, %v1227_v39  ;;  %v952_v23 = vmul.f32 %v3377_v6, %v2521_v13 }
  0xe4   : > { %v1276_v60 = vmul.f32 %v2342_v1, %v2525_v15  ;;  %v546_v63 = vsel %vm486_vm0, %v543_v44, %v545_v26  ;;  %v1151_v4 = vrot.slane %v1032_v48, 1  ;;  %v1637_v61 = vmul.f32 %v2390_v59, %v2538_v22 }
  0xe5   : > { %v791_v43 = vsel %vm731_vm1, %v788_v41, %v790_v36  ;;  %2147 = vst.msk [vmem:[%s2631_s4 + $0xa8] sm:$0xff] %vm2125_vm2, %v2114_v7  ;;  %v1588_v47 = vadd.f32 %v1556_v32, %v1471_v31  ;;  %v622_v0 = vadd.f32 %v546_v63, %v345_v55  ;;  %v1881_v5 = vmul.f32 %v2390_v59, %v2568_v49  ;;  %v3541_v7 = vld [vmem:[%s2511_s25 + $0x158] sm:$0xff] }
  0xe6   : > { %v1395_v18 = vrot.slane %v1276_v60, 2  ;;  %v1999_v52 = vsel %vm731_vm1, %v1997_v3, %v1998_v62  ;;  %v1152_v2 = vsel %vm486_vm0, %v1149_v28, %v1151_v4  ;;  %v1557_v12 = vmul.f32 %v3459_v57, %v2527_v16  ;;  %v308_v4 = vld [vmem:[%s2511_s25 + $0x130] sm:$0x3] }
  0xe7   : > { %v426_v44 = vmul.f32 %v3371_v56, %v2515_v9  ;;  %v1832_v41 = vadd.f32 %v1755_v34, %v1588_v47  ;;  %v867_v40 = vadd.f32 %v791_v43, %v622_v0  ;;  %v1756_v51 = vrot.slane %v1637_v61, 1  ;;  %v3535_v34 = vld [vmem:[%s2511_s25 + $0x150] sm:$0xff] }
  0xe8   : > { %v346_v24 = vmul.f32 %v3371_v56, %v2513_v8  ;;  %v1396_v35 = vsel %vm731_vm1, %v1393_v37, %v1395_v18  ;;  %v3512_v54 = vmul.f32 %v3377_v6, %v2515_v9  ;;  %v671_v28 = vmul.f32 %v3371_v56, %v2517_v10 }
  0xe9   : > { %v547_v19 = vrot.slane %v426_v44, 1  ;;  %v2076_v58 = vadd.f32 %v1999_v52, %v1832_v41  ;;  %v984_v38 = vadd.f32 %v952_v23, %v867_v40  ;;  %v2000_v42 = vrot.slane %v1881_v5, 2  ;;  %v2345_v52 = vld [vmem:[%s2511_s25 + $0x148] sm:$0x3] }
  0xea   : > { %v672_v11 = vmul.f32 %v3377_v6, %v2517_v10  ;;  %v548_v53 = vrot.slane %v3512_v54, 1  ;;  %v792_v27 = vrot.slane %v671_v28, 2  ;;  %v953_v37 = vmul.f32 %v3453_v33, %v2521_v13  ;;  %v2393_v54 = vld [vmem:[%s2511_s25 + $0x160] sm:$0x3] }
  0xeb   : > { %v1033_v20 = vmul.f32 %v3453_v33, %v2523_v14  ;;  %v2115_v46 = vadd.f32 %v3161_v17, %v2076_v58  ;;  %v1228_v56 = vadd.f32 %v1152_v2, %v984_v38  ;;  %v1034_v1 = vmul.f32 %v3459_v57, %v2523_v14 }
  0xec   : > { %v793_v32 = vrot.slane %v672_v11, 2  ;;  %v549_v45 = vsel %vm486_vm0, %v547_v19, %v548_v53  ;;  %v1277_v50 = vmul.f32 %v3453_v33, %v2525_v15  ;;  %v1278_v30 = vmul.f32 %v3459_v57, %v2525_v15 }
  0xed   : > { %v1153_v55 = vrot.slane %v1033_v20, 1  ;;  %2148 = vst.msk [vmem:[%s2631_s4 + $0xb0] sm:$0xff] %vm2125_vm2, %v2115_v46  ;;  %v1472_v21 = vadd.f32 %v1396_v35, %v1228_v56  ;;  %v623_v39 = vadd.f32 %v549_v45, %v346_v24  ;;  %v1154_v59 = vrot.slane %v1034_v1, 1 }
  0xee   : > { %v794_v3 = vsel %vm731_vm1, %v792_v27, %v793_v32  ;;  %v1757_v26 = vsel %vm486_vm0, %v1754_v29, %v1756_v51  ;;  %v1397_v36 = vrot.slane %v1277_v50, 2  ;;  %v1398_v48 = vrot.slane %v1278_v30, 2 }
  0xef   : > { %v1638_v31 = vmul.f32 %v3535_v34, %v2538_v22  ;;  %v1589_v23 = vadd.f32 %v1557_v12, %v1472_v21  ;;  %v2001_v60 = vsel %vm731_vm1, %v1998_v62, %v2000_v42  ;;  %v868_v63 = vadd.f32 %v794_v3, %v623_v39 }
  0xf0   : > { %v3548_v43 = vmul.f32 %v3541_v7, %v2538_v22  ;;  %v1155_v25 = vsel %vm486_vm0, %v1153_v55, %v1154_v59  ;;  %v1882_v61 = vmul.f32 %v3535_v34, %v2568_v49  ;;  %v3556_v47 = vmul.f32 %v3541_v7, %v2568_v49 }
  0xf1   : > { %v1758_v29 = vrot.slane %v1638_v31, 1  ;;  %v1833_v0 = vadd.f32 %v1757_v26, %v1589_v23  ;;  %v985_v18 = vadd.f32 %v953_v37, %v868_v63  ;;  %v1558_v62 = vmul.f32 %v3535_v34, %v2527_v16 }
  0xf2   : > { %v1759_v5 = vrot.slane %v3548_v43, 1  ;;  %v1399_v2 = vsel %vm731_vm1, %v1397_v36, %v1398_v48  ;;  %v347_v12 = vmul.f32 %v3377_v6, %v2513_v8  ;;  %v428_v44 = vmul.f32 %v2515_v9, %v308_v4 }
  0xf3   : > { %v673_v41 = vmul.f32 %v2517_v10, %v308_v4  ;;  %v2077_v40 = vadd.f32 %v2001_v60, %v1833_v0  ;;  %v1229_v51 = vadd.f32 %v1155_v25, %v985_v18  ;;  %v2002_v24 = vrot.slane %v1882_v61, 2 }
  0xf4   : > { %v2003_v35 = vrot.slane %v3556_v47, 2  ;;  %v1760_v19 = vsel %vm486_vm0, %v1758_v29, %v1759_v5  ;;  %v550_v28 = vrot.slane %v428_v44, 1  ;;  %v1035_v38 = vmul.f32 %v2345_v52, %v2523_v14 }
  0xf5   : > { %v795_v58 = vrot.slane %v673_v41, 2  ;;  %v2116_v6 = vadd.f32 %v3161_v17, %v2077_v40  ;;  %v1473_v42 = vadd.f32 %v1399_v2, %v1229_v51  ;;  %v954_v11 = vmul.f32 %v3459_v57, %v2521_v13 }
  0xf6   : > { %v1279_v27 = vmul.f32 %v2345_v52, %v2525_v15  ;;  %v551_v37 = vsel %vm486_vm0, %v548_v53, %v550_v28  ;;  %v1156_v46 = vrot.slane %v1035_v38, 1  ;;  %v1640_v56 = vmul.f32 %v2393_v54, %v2538_v22 }
  0xf7   : > { %v796_v20 = vsel %vm731_vm1, %v793_v32, %v795_v58  ;;  %2149 = vst.msk [vmem:[%s2631_s4 + $0xb8] sm:$0xff] %vm2125_vm2, %v2116_v6  ;;  %v1590_v1 = vadd.f32 %v1558_v62, %v1473_v42  ;;  %v624_v45 = vadd.f32 %v551_v37, %v347_v12  ;;  %v1884_v50 = vmul.f32 %v2393_v54, %v2568_v49  ;;  %v3623_v6 = vld [vmem:[%s2511_s25 + $0x170] sm:$0xff] }
  0xf8   : > { %v1400_v55 = vrot.slane %v1279_v27, 2  ;;  %v2004_v30 = vsel %vm731_vm1, %v2002_v24, %v2003_v35  ;;  %v1157_v21 = vsel %vm486_vm0, %v1154_v59, %v1156_v46  ;;  %v1559_v39 = vmul.f32 %v3541_v7, %v2527_v16  ;;  %v311_v46 = vld [vmem:[%s2511_s25 + $0x148] sm:$0x3] }
  0xf9   : > { %v429_v53 = vmul.f32 %v3453_v33, %v2515_v9  ;;  %v1834_v32 = vadd.f32 %v1760_v19, %v1590_v1  ;;  %v869_v3 = vadd.f32 %v796_v20, %v624_v45  ;;  %v1761_v26 = vrot.slane %v1640_v56, 1  ;;  %v3617_v19 = vld [vmem:[%s2511_s25 + $0x168] sm:$0xff] }
  0xfa   : > { %v348_v36 = vmul.f32 %v3453_v33, %v2513_v8  ;;  %v1401_v31 = vsel %vm731_vm1, %v1398_v48, %v1400_v55  ;;  %v3594_v23 = vmul.f32 %v3459_v57, %v2515_v9  ;;  %v674_v59 = vmul.f32 %v3453_v33, %v2517_v10 }
  0xfb   : > { %v552_v60 = vrot.slane %v429_v53, 1  ;;  %v2078_v63 = vadd.f32 %v2004_v30, %v1834_v32  ;;  %v986_v4 = vadd.f32 %v954_v11, %v869_v3  ;;  %v2005_v25 = vrot.slane %v1884_v50, 2  ;;  %v2348_v30 = vld [vmem:[%s2511_s25 + $0x160] sm:$0x3] }
  0xfc   : > { %v675_v29 = vmul.f32 %v3459_v57, %v2517_v10  ;;  %v553_v61 = vrot.slane %v3594_v23, 1  ;;  %v797_v47 = vrot.slane %v674_v59, 2  ;;  %v955_v48 = vmul.f32 %v3535_v34, %v2521_v13  ;;  %v2396_v23 = vld [vmem:[%s2511_s25 + $0x178] sm:$0x3] }
  0xfd   : > { %v1036_v0 = vmul.f32 %v3535_v34, %v2523_v14  ;;  %v2117_v18 = vadd.f32 %v3161_v17, %v2078_v63  ;;  %v1230_v33 = vadd.f32 %v1157_v21, %v986_v4  ;;  %v1037_v52 = vmul.f32 %v3541_v7, %v2523_v14 }
  0xfe   : > { %v798_v62 = vrot.slane %v675_v29, 2  ;;  %v554_v2 = vsel %vm486_vm0, %v552_v60, %v553_v61  ;;  %v1280_v44 = vmul.f32 %v3535_v34, %v2525_v15  ;;  %v1281_v41 = vmul.f32 %v3541_v7, %v2525_v15 }
  0xff   : > { %v1158_v12 = vrot.slane %v1036_v0, 1  ;;  %2150 = vst.msk [vmem:[%s2631_s4 + $0xc0] sm:$0xff] %vm2125_vm2, %v2117_v18  ;;  %v1474_v40 = vadd.f32 %v1401_v31, %v1230_v33  ;;  %v625_v51 = vadd.f32 %v554_v2, %v348_v36  ;;  %v1159_v54 = vrot.slane %v1037_v52, 1 }
 0x100   : > { %v799_v24 = vsel %vm731_vm1, %v797_v47, %v798_v62  ;;  %v1762_v28 = vsel %vm486_vm0, %v1759_v5, %v1761_v26  ;;  %v1402_v58 = vrot.slane %v1280_v44, 2  ;;  %v1403_v38 = vrot.slane %v1281_v41, 2 }
 0x101   : > { %v1641_v42 = vmul.f32 %v3617_v19, %v2538_v22  ;;  %v1591_v11 = vadd.f32 %v1559_v39, %v1474_v40  ;;  %v2006_v27 = vsel %vm731_vm1, %v2003_v35, %v2005_v25  ;;  %v870_v37 = vadd.f32 %v799_v24, %v625_v51 }
 0x102   : > { %v3630_v20 = vmul.f32 %v3623_v6, %v2538_v22  ;;  %v1160_v43 = vsel %vm486_vm0, %v1158_v12, %v1159_v54  ;;  %v1885_v56 = vmul.f32 %v3617_v19, %v2568_v49  ;;  %v3638_v1 = vmul.f32 %v3623_v6, %v2568_v49 }
 0x103   : > { %v1763_v5 = vrot.slane %v1641_v42, 1  ;;  %v1835_v45 = vadd.f32 %v1762_v28, %v1591_v11  ;;  %v987_v55 = vadd.f32 %v955_v48, %v870_v37  ;;  %v1560_v35 = vmul.f32 %v3617_v19, %v2527_v16 }
 0x104   : > { %v1764_v50 = vrot.slane %v3630_v20, 1  ;;  %v1404_v21 = vsel %vm731_vm1, %v1402_v58, %v1403_v38  ;;  %v349_v39 = vmul.f32 %v3459_v57, %v2513_v8  ;;  %v431_v53 = vmul.f32 %v2515_v9, %v311_v46  ;;  %v314_v20 = vld [vmem:[%s2511_s25 + $0x160] sm:$0x3] }
 0x105   : > { %v676_v32 = vmul.f32 %v2517_v10, %v311_v46  ;;  %v2079_v3 = vadd.f32 %v2006_v27, %v1835_v45  ;;  %v1231_v26 = vadd.f32 %v1160_v43, %v987_v55  ;;  %v2007_v36 = vrot.slane %v1885_v56, 2 }
 0x106   : > { %v2008_v31 = vrot.slane %v3638_v1, 2  ;;  %v1765_v60 = vsel %vm486_vm0, %v1763_v5, %v1764_v50  ;;  %v555_v59 = vrot.slane %v431_v53, 1  ;;  %v1038_v4 = vmul.f32 %v2348_v30, %v2523_v14 }
 0x107   : > { %v800_v63 = vrot.slane %v676_v32, 2  ;;  %v2118_v57 = vadd.f32 %v3161_v17, %v2079_v3  ;;  %v1475_v25 = vadd.f32 %v1404_v21, %v1231_v26  ;;  %v956_v29 = vmul.f32 %v3541_v7, %v2521_v13 }
 0x108   : > { %v1282_v47 = vmul.f32 %v2348_v30, %v2525_v15  ;;  %v556_v48 = vsel %vm486_vm0, %v553_v61, %v555_v59  ;;  %v1161_v18 = vrot.slane %v1038_v4, 1  ;;  %v1643_v33 = vmul.f32 %v2396_v23, %v2538_v22  ;;  %v3708_v4 = vld [vmem:[%s2511_s25 + $0x188] sm:$0xff] }
 0x109   : > { %v801_v0 = vsel %vm731_vm1, %v798_v62, %v800_v63  ;;  %2151 = vst.msk [vmem:[%s2631_s4 + $0xc8] sm:$0xff] %vm2125_vm2, %v2118_v57  ;;  %v1592_v52 = vadd.f32 %v1560_v35, %v1475_v25  ;;  %v626_v2 = vadd.f32 %v556_v48, %v349_v39  ;;  %v1887_v44 = vmul.f32 %v2396_v23, %v2568_v49  ;;  %v3701_v23 = vld [vmem:[%s2511_s25 + $0x180] sm:$0xff] }
 0x10a   : > { %v1405_v12 = vrot.slane %v1282_v47, 2  ;;  %v2009_v41 = vsel %vm731_vm1, %v2007_v36, %v2008_v31  ;;  %v1162_v40 = vsel %vm486_vm0, %v1159_v54, %v1161_v18  ;;  %v1561_v51 = vmul.f32 %v3623_v6, %v2527_v16 }
 0x10b   : > { %v432_v61 = vmul.f32 %v3535_v34, %v2515_v9  ;;  %v1836_v62 = vadd.f32 %v1765_v60, %v1592_v52  ;;  %v871_v24 = vadd.f32 %v801_v0, %v626_v2  ;;  %v1766_v28 = vrot.slane %v1643_v33, 1 }
 0x10c   : > { %v350_v58 = vmul.f32 %v3535_v34, %v2513_v8  ;;  %v1406_v42 = vsel %vm731_vm1, %v1403_v38, %v1405_v12  ;;  %v3676_v11 = vmul.f32 %v3541_v7, %v2515_v9  ;;  %v677_v54 = vmul.f32 %v3535_v34, %v2517_v10 }
 0x10d   : > { %v557_v27 = vrot.slane %v432_v61, 1  ;;  %v2080_v37 = vadd.f32 %v2009_v41, %v1836_v62  ;;  %v988_v46 = vadd.f32 %v956_v29, %v871_v24  ;;  %v2010_v43 = vrot.slane %v1887_v44, 2  ;;  %v2351_v44 = vld [vmem:[%s2511_s25 + $0x178] sm:$0x3] }
 0x10e   : > { %v678_v5 = vmul.f32 %v3541_v7, %v2517_v10  ;;  %v558_v56 = vrot.slane %v3676_v11, 1  ;;  %v802_v1 = vrot.slane %v677_v54, 2  ;;  %v957_v38 = vmul.f32 %v3617_v19, %v2521_v13 }
 0x10f   : > { %v1039_v45 = vmul.f32 %v3617_v19, %v2523_v14  ;;  %v2119_v55 = vadd.f32 %v3161_v17, %v2080_v37  ;;  %v1232_v34 = vadd.f32 %v1162_v40, %v988_v46  ;;  %v1040_v30 = vmul.f32 %v3623_v6, %v2523_v14 }
 0x110   : > { %v803_v35 = vrot.slane %v678_v5, 2  ;;  %v559_v21 = vsel %vm486_vm0, %v557_v27, %v558_v56  ;;  %v1283_v53 = vmul.f32 %v3617_v19, %v2525_v15  ;;  %v3695_v32 = vmul.f32 %v3623_v6, %v2525_v15 }
 0x111   : > { %v1163_v39 = vrot.slane %v1039_v45, 1  ;;  %2152 = vst.msk [vmem:[%s2631_s4 + $0xd0] sm:$0xff] %vm2125_vm2, %v2119_v55  ;;  %v1476_v17 = vadd.f32 %v1406_v42, %v1232_v34  ;;  %v627_v3 = vadd.f32 %v559_v21, %v350_v58  ;;  %v1164_v36 = vrot.slane %v1040_v30, 1  ;;  %v2399_v42 = vld [vmem:[%s2511_s25 + $0x190] sm:$0x3] }
 0x112   : > { %v804_v26 = vsel %vm731_vm1, %v802_v1, %v803_v35  ;;  %v1767_v60 = vsel %vm486_vm0, %v1764_v50, %v1766_v28  ;;  %v1407_v59 = vrot.slane %v1283_v53, 2  ;;  %v1408_v63 = vrot.slane %v3695_v32, 2 }
 0x113   : > { %v1644_v57 = vmul.f32 %v3701_v23, %v2538_v22  ;;  %v1593_v25 = vadd.f32 %v1561_v51, %v1476_v17  ;;  %v2011_v29 = vsel %vm731_vm1, %v2008_v31, %v2010_v43  ;;  %v872_v47 = vadd.f32 %v804_v26, %v627_v3 }
 0x114   : > { %v3715_v48 = vmul.f32 %v3708_v4, %v2538_v22  ;;  %v1165_v50 = vsel %vm486_vm0, %v1163_v39, %v1164_v36  ;;  %v1888_v18 = vmul.f32 %v3701_v23, %v2568_v49  ;;  %v3723_v33 = vmul.f32 %v3708_v4, %v2568_v49 }
 0x115   : > { %v1768_v0 = vrot.slane %v1644_v57, 1  ;;  %v1837_v52 = vadd.f32 %v1767_v60, %v1593_v25  ;;  %v989_v2 = vadd.f32 %v957_v38, %v872_v47  ;;  %v1562_v31 = vmul.f32 %v3701_v23, %v2527_v16 }
 0x116   : > { %v1769_v12 = vrot.slane %v3715_v48, 1  ;;  %v1409_v41 = vsel %vm731_vm1, %v1407_v59, %v1408_v63  ;;  %v351_v40 = vmul.f32 %v3541_v7, %v2513_v8  ;;  %v434_v51 = vmul.f32 %v2515_v9, %v314_v20  ;;  %v3743_v7 = vld [vmem:[%s3844_s2] ss:$0 sm:$0xff] }
 0x117   : > { %v679_v61 = vmul.f32 %v2517_v10, %v314_v20  ;;  %v2081_v62 = vadd.f32 %v2011_v29, %v1837_v52  ;;  %v1233_v24 = vadd.f32 %v1165_v50, %v989_v2  ;;  %v2012_v28 = vrot.slane %v1888_v18, 2 }
 0x118   : > { %v2013_v58 = vrot.slane %v3723_v33, 2  ;;  %v1770_v11 = vsel %vm486_vm0, %v1768_v0, %v1769_v12  ;;  %v560_v27 = vrot.slane %v434_v51, 1  ;;  %v1041_v37 = vmul.f32 %v2351_v44, %v2523_v14 }
 0x119   : > { %v805_v54 = vrot.slane %v679_v61, 2  ;;  %v2120_v46 = vadd.f32 %v3743_v7, %v2081_v62  ;;  %v1477_v43 = vadd.f32 %v1409_v41, %v1233_v24  ;;  %v958_v5 = vmul.f32 %v3623_v6, %v2521_v13 }
 0x11a   : > { %v1285_v1 = vmul.f32 %v2351_v44, %v2525_v15  ;;  %v561_v38 = vsel %vm486_vm0, %v558_v56, %v560_v27  ;;  %v1166_v55 = vrot.slane %v1041_v37, 1  ;;  %v1646_v34 = vmul.f32 %v2399_v42, %v2538_v22 }
 0x11b   : > { %v806_v45 = vsel %vm731_vm1, %v803_v35, %v805_v54  ;;  %2153 = vst.msk [vmem:[%s2631_s4 + $0xd8] sm:$0xff] %vm2125_vm2, %v2120_v46  ;;  %v1594_v30 = vadd.f32 %v1562_v31, %v1477_v43  ;;  %v628_v21 = vadd.f32 %v561_v38, %v351_v40  ;;  %v1890_v53 = vmul.f32 %v2399_v42, %v2568_v49  ;;  %v2400_v40 = vld [vmem:[%s2511_s25 + $0x198] sm:$0xff] }
 0x11c   : > { %v1410_v39 = vrot.slane %v1285_v1, 2  ;;  %v2014_v32 = vsel %vm731_vm1, %v2012_v28, %v2013_v58  ;;  %v1167_v17 = vsel %vm486_vm0, %v1164_v36, %v1166_v55  ;;  %v1563_v56 = vmul.f32 %v3708_v4, %v2527_v16  ;;  %v2401_v28 = vld [vmem:[%s2511_s25 + $0x1a0] sm:$0xff] }
 0x11d   : > { %v435_v35 = vmul.f32 %v3617_v19, %v2515_v9  ;;  %v1838_v3 = vadd.f32 %v1770_v11, %v1594_v30  ;;  %v873_v26 = vadd.f32 %v806_v45, %v628_v21  ;;  %v1771_v60 = vrot.slane %v1646_v34, 1  ;;  %v317_v45 = vld [vmem:[%s2511_s25 + $0x178] sm:$0x3] }
 0x11e   : > { %v352_v59 = vmul.f32 %v3617_v19, %v2513_v8  ;;  %v1411_v57 = vsel %vm731_vm1, %v1408_v63, %v1410_v39  ;;  %v436_v25 = vmul.f32 %v3623_v6, %v2515_v9  ;;  %v680_v36 = vmul.f32 %v3617_v19, %v2517_v10 }
 0x11f   : > { %v562_v29 = vrot.slane %v435_v35, 1  ;;  %v2082_v47 = vadd.f32 %v2014_v32, %v1838_v3  ;;  %v990_v20 = vadd.f32 %v958_v5, %v873_v26  ;;  %v2015_v50 = vrot.slane %v1890_v53, 2  ;;  %v2354_v32 = vld [vmem:[%s2511_s25 + $0x190] sm:$0x3] }
 0x120   : > { %v681_v0 = vmul.f32 %v3623_v6, %v2517_v10  ;;  %v563_v18 = vrot.slane %v436_v25, 1  ;;  %v807_v52 = vrot.slane %v680_v36, 2  ;;  %v959_v63 = vmul.f32 %v3701_v23, %v2521_v13 }
 0x121   : > { %v1042_v2 = vmul.f32 %v3701_v23, %v2523_v14  ;;  %v2121_v31 = vadd.f32 %v3743_v7, %v2082_v47  ;;  %v1234_v44 = vadd.f32 %v1167_v17, %v990_v20  ;;  %v1043_v41 = vmul.f32 %v3708_v4, %v2523_v14 }
 0x122   : > { %v808_v19 = vrot.slane %v681_v0, 2  ;;  %v564_v51 = vsel %vm486_vm0, %v562_v29, %v563_v18  ;;  %v1286_v62 = vmul.f32 %v3701_v23, %v2525_v15  ;;  %v1287_v24 = vmul.f32 %v3708_v4, %v2525_v15 }
 0x123   : > { %v1168_v61 = vrot.slane %v1042_v2, 1  ;;  %2154 = vst.msk [vmem:[%s2631_s4 + $0xe0] sm:$0xff] %vm2125_vm2, %v2121_v31  ;;  %v1478_v42 = vadd.f32 %v1411_v57, %v1234_v44  ;;  %v629_v11 = vadd.f32 %v564_v51, %v352_v59  ;;  %v1169_v54 = vrot.slane %v1043_v41, 1 }
 0x124   : > { %v809_v27 = vsel %vm731_vm1, %v807_v52, %v808_v19  ;;  %v1772_v37 = vsel %vm486_vm0, %v1769_v12, %v1771_v60  ;;  %v1412_v46 = vrot.slane %v1286_v62, 2  ;;  %v1413_v43 = vrot.slane %v1287_v24, 2 }
 0x125   : > { %v1647_v23 = vmul.f32 %v2400_v40, %v2538_v22  ;;  %v1595_v5 = vadd.f32 %v1563_v56, %v1478_v42  ;;  %v874_v1 = vadd.f32 %v809_v27, %v629_v11  ;;  %v1648_v38 = vmul.f32 %v2401_v28, %v2538_v22 }
 0x126   : > { %v2016_v55 = vsel %vm731_vm1, %v2013_v58, %v2015_v50  ;;  %v1170_v34 = vsel %vm486_vm0, %v1168_v61, %v1169_v54  ;;  %v1891_v48 = vmul.f32 %v2400_v40, %v2568_v49  ;;  %v1892_v12 = vmul.f32 %v2401_v28, %v2568_v49 }
 0x127   : > { %v1839_v30 = vadd.f32 %v1772_v37, %v1595_v5  ;;  %v991_v21 = vadd.f32 %v959_v63, %v874_v1  ;;  %v1414_v39 = vsel %vm731_vm1, %v1412_v46, %v1413_v43  ;;  %v1564_v53 = vmul.f32 %v2400_v40, %v2527_v16 }
 0x128   : > { %v1773_v17 = vrot.slane %v1647_v23, 1  ;;  %v1774_v56 = vrot.slane %v1648_v38, 1  ;;  %v437_v33 = vmul.f32 %v2515_v9, %v317_v45  ;;  %v682_v58 = vmul.f32 %v2517_v10, %v317_v45  ;;  %v2402_v9 = vld [vmem:[%s2511_s25 + $0x1a8] sm:$0x3] }
 0x129   : > { %v2083_v35 = vadd.f32 %v2016_v55, %v1839_v30  ;;  %v1235_v3 = vadd.f32 %v1170_v34, %v991_v21  ;;  %v2017_v26 = vrot.slane %v1891_v48, 2  ;;  %v353_v60 = vmul.f32 %v3623_v6, %v2513_v8 }
 0x12a   : > { %v2018_v59 = vrot.slane %v1892_v12, 2  ;;  %v565_v57 = vrot.slane %v437_v33, 1  ;;  %v810_v25 = vrot.slane %v682_v58, 2  ;;  %v1044_v29 = vmul.f32 %v2354_v32, %v2523_v14 }
 0x12b   : > { %v2122_v36 = vadd.f32 %v3743_v7, %v2083_v35  ;;  %v1479_v47 = vadd.f32 %v1414_v39, %v1235_v3  ;;  %v1288_v20 = vmul.f32 %v2354_v32, %v2525_v15  ;;  %v1775_v10 = vsel %vm486_vm0, %v1773_v17, %v1774_v56 }
 0x12c   : > { %v566_v50 = vsel %vm486_vm0, %v563_v18, %v565_v57  ;;  %v811_v0 = vsel %vm731_vm1, %v808_v19, %v810_v25  ;;  %v1171_v52 = vrot.slane %v1044_v29, 1  ;;  %v960_v14 = vmul.f32 %v3708_v4, %v2521_v13 }
 0x12d   : > { %2155 = vst.msk [vmem:[%s2631_s4 + $0xe8] sm:$0xff] %vm2125_vm2, %v2122_v36  ;;  %v1596_v8 = vadd.f32 %v1564_v53, %v1479_v47  ;;  %v630_v6 = vadd.f32 %v566_v50, %v353_v60  ;;  %v2019_v63 = vsel %vm731_vm1, %v2017_v26, %v2018_v59  ;;  %v1415_v2 = vrot.slane %v1288_v20, 2 }
 0x12e   : > { %v1649_v15 = vmul.f32 %v2402_v9, %v2538_v22  ;;  %v1172_v18 = vsel %vm486_vm0, %v1169_v54, %v1171_v52  ;;  %v1893_v19 = vmul.f32 %v2402_v9, %v2568_v49  ;;  %v1565_v62 = vmul.f32 %v2401_v28, %v2527_v16 }
 0x12f   : > { %v1840_v31 = vadd.f32 %v1775_v10, %v1596_v8  ;;  %v875_v44 = vadd.f32 %v811_v0, %v630_v6  ;;  %v1416_v51 = vsel %vm731_vm1, %v1413_v43, %v1415_v2 }
 0x130   : > { %v1776_v61 = vrot.slane %v1649_v15, 1  ;;  %v2020_v24 = vrot.slane %v1893_v19, 2 }
 0x131   : > { %v2084_v41 = vadd.f32 %v2019_v63, %v1840_v31  ;;  %v992_v40 = vadd.f32 %v960_v14, %v875_v44 }
 0x132   : > { %v1777_v42 = vsel %vm486_vm0, %v1774_v56, %v1776_v61  ;;  %v2021_v49 = vsel %vm731_vm1, %v2018_v59, %v2020_v24 }
 0x133   : > { %v2123_v13 = vadd.f32 %v3743_v7, %v2084_v41  ;;  %v1236_v4 = vadd.f32 %v1172_v18, %v992_v40 }
 0x135   : > { %2156 = vst.msk [vmem:[%s2631_s4 + $0xf0] sm:$0xff] %vm2125_vm2, %v2123_v13  ;;  %v1480_v22 = vadd.f32 %v1416_v51, %v1236_v4 }
 0x137   : > { %v1597_v11 = vadd.f32 %v1565_v62, %v1480_v22 }
 0x139   : > { %v1841_v27 = vadd.f32 %v1777_v42, %v1597_v11 }
 0x13b   : > { %v2085_v54 = vadd.f32 %v2021_v49, %v1841_v27 }
 0x13d   : > { %v2124_v37 = vadd.f32 %v3743_v7, %v2085_v54 }
 0x13f   : > { %2157 = vst.msk [vmem:[%s2631_s4 + $0xf8] sm:$0xff] %vm2125_vm2, %v2124_v37 }
 0x140 PF: > { %s13_s14 = sadd.s32 1, %s2456_s14   ;;  %s3846_s12 = smov %s2452_s13 }
 0x141   : > { %p10_p5 = scmp.ge.s32.totalorder %s13_s14, 4   ;;  %s3847_s13 = smov %s3849_s15 }
 0x143   :  { %12 = sbr.rel (!%p10_p5) target bundleno = 2 (0x2), region = 70 }

</bundles_post_ra>
